<compile_context>
chip_gen: v7x
topology: tpu7x:2x2x1
jax: 0.10.0
libtpu: 0.0.40
codegen_flags: <defaults>
</compile_context>

<pallas_src>
import math

import jax
import jax.numpy as jnp
from jax import lax
from jax.experimental import pallas as pl
from jax.experimental.pallas import tpu as pltpu

SIGMA_MIN = 0.1
SIGMA_MAX = 10.0
C = 2.0
LOG_SIGMA_MIN = math.log(SIGMA_MIN)
LOG_SIGMA_MAX = math.log(SIGMA_MAX)
MU_CLAMP = math.sqrt(C)

_TOPIC_CHUNK = 8  # sublane-aligned store chunk (8 sublanes per f32 vreg)


def _pass1_kernel(mu_ref, ls_ref, muc_ref, sigc_ref, e_ref, m_ref, l_ref):
    """Pass 1: lane-dense energy tile to HBM + online (max, sum-of-exp).

    mu_ref / ls_ref    : [E, V_tile]  vocab params, V on lanes
    muc_ref / sigc_ref : [E, T]       topic params (pre-clipped / pre-exp'd)
    e_ref              : [T, V_tile]  lane-dense energy output tile
    m_ref / l_ref      : [T, 1]       running max / sum-of-exp (this core's part)
    """
    @pl.when(pl.program_id(1) == 0)
    def _():
        m_ref[...] = jnp.full(m_ref.shape, -jnp.inf, dtype=jnp.float32)
        l_ref[...] = jnp.zeros(l_ref.shape, dtype=jnp.float32)

    mu = jnp.clip(mu_ref[...], -MU_CLAMP, MU_CLAMP)                       # [E, Vt]
    sigma = jnp.exp(jnp.clip(ls_ref[...], LOG_SIGMA_MIN, LOG_SIGMA_MAX))  # [E, Vt]
    mu_c = muc_ref[...]                                                   # [E, T]
    sigma_c = sigc_ref[...]                                               # [E, T]

    n_topics = muc_ref.shape[1]
    # TODO(synk): for very large T switch this chunk loop to
    # lax.fori_loop(..., unroll=_TOPIC_CHUNK) to bound vreg live ranges.
    for base in range(0, n_topics, _TOPIC_CHUNK):
        hi = min(base + _TOPIC_CHUNK, n_topics)
        rows = []
        for t in range(base, hi):
            s = sigma + sigma_c[:, t:t + 1]                  # [E, Vt]
            d = mu - mu_c[:, t:t + 1]                        # [E, Vt]
            z = jnp.log(s) + (d * d) / s                     # fused -> 1 XLU reduce
            rows.append(-0.5 * jnp.sum(z, axis=0, keepdims=True))        # [1, Vt]
        # E*log(2*pi) constant is dropped (cancels in the softmax).
        blk = jnp.concatenate(rows, axis=0) if len(rows) > 1 else rows[0]
        e_ref[base:hi, :] = blk                              # unmasked chunk store

        # Online (max, sum-of-exp) update for this chunk of topic rows.
        c_max = jnp.max(blk, axis=1, keepdims=True)          # [c, 1]
        m_old = m_ref[base:hi, :]
        m_new = jnp.maximum(m_old, c_max)
        p_sum = jnp.sum(jnp.exp(blk - m_new), axis=1, keepdims=True)
        l_ref[base:hi, :] = l_ref[base:hi, :] * jnp.exp(m_old - m_new) + p_sum
        m_ref[base:hi, :] = m_new


def _pass2_kernel(off_ref, e_ref, x_ref, w_ref, out_ref):
    """Pass 2: normalize one stored-energy V block + matmul (no recompute).

    off_ref : [T, 1]       softmax offset per topic (max + log sum-exp)
    e_ref   : [T, V_tile]  energy tile produced by pass 1
    x_ref   : [T, D]
    w_ref   : [T, V_tile]  lane-dense w^T tile
    out_ref : [D, V_tile]  lane-dense out^T tile
    """
    w = jnp.exp(e_ref[...] - off_ref[...])                   # [T, Vt]
    w_ref[...] = w
    # out^T[d, v] = sum_t x[t, d] * w[t, v]   -> lane-dense [D, Vt] store.
    out_ref[...] = lax.dot_general(
        x_ref[...], w,
        dimension_numbers=(((0,), (0,)), ((), ())),
        preferred_element_type=jnp.float32)


def gauss_softmax_etm(mu, log_sigma, mu_c, log_sigma_c, x, *, v_tile=2048,
                      vmem_limit_bytes=64 * 1024 * 1024):
    """Returns (out [V, D], w [V, T]).

    v_tile: vocab columns per grid step (multiple of 128, clamped to V).
    Larger tiles amortize the ~0.35 us per-grid-step overhead; the per-step
    working set (~2*E*v_tile*4 B per double-buffered input + (T+D)*v_tile*4 B
    of outputs) stays a few MiB even at v_tile=2048 for moderate E/T/D.
    """
    V, E = mu.shape
    T = mu_c.shape[0]
    D = x.shape[-1]

    v_tile = min(v_tile, V)
    assert v_tile % 128 == 0, "v_tile must be a multiple of 128 lanes"
    assert V % v_tile == 0, "V must divide by v_tile"  # TODO(synk): pad V otherwise
    nv = V // v_tile
    # Split pass 1 across the two v7x TensorCores when the block count allows;
    # on single-TC chips the extra axis just iterates (near-zero overhead).
    num_parts = 2 if (nv >= 2 and nv % 2 == 0) else 1
    nv_per = nv // num_parts

    f32 = jnp.float32

    # Layout plumbing: put V on the lane axis for all kernel-side tensors.
    # TODO(synk): mu/log_sigma are parameters -- cache these transposed slabs
    # across calls if they are reused (the transpose is a full HBM pass, most
    # costly on v5e).
    mu_t = jnp.transpose(mu)                                              # [E, V]
    ls_t = jnp.transpose(log_sigma)                                       # [E, V]
    # Topic params are tiny [T, E]: pre-clip / pre-exp once in the wrapper.
    muc_t = jnp.clip(jnp.transpose(mu_c), -MU_CLAMP, MU_CLAMP)            # [E, T]
    sigc_t = jnp.exp(jnp.clip(jnp.transpose(log_sigma_c),
                              LOG_SIGMA_MIN, LOG_SIGMA_MAX))              # [E, T]

    # ---- Pass 1: lane-dense energy + per-topic running (max, sum-of-exp) ----
    e_t, m_parts, l_parts = pl.pallas_call(
        _pass1_kernel,
        out_shape=(jax.ShapeDtypeStruct((T, V), f32),
                   jax.ShapeDtypeStruct((num_parts, T, 1), f32),
                   jax.ShapeDtypeStruct((num_parts, T, 1), f32)),
        grid=(num_parts, nv_per),
        in_specs=[
            pl.BlockSpec((E, v_tile), lambda c, i: (0, c * nv_per + i)),
            pl.BlockSpec((E, v_tile), lambda c, i: (0, c * nv_per + i)),
            pl.BlockSpec((E, T), lambda c, i: (0, 0)),
            pl.BlockSpec((E, T), lambda c, i: (0, 0)),
        ],
        out_specs=(
            pl.BlockSpec((T, v_tile), lambda c, i: (0, c * nv_per + i)),
            pl.BlockSpec((None, T, 1), lambda c, i: (c, 0, 0)),
            pl.BlockSpec((None, T, 1), lambda c, i: (c, 0, 0)),
        ),
        compiler_params=pltpu.CompilerParams(
            dimension_semantics=("parallel", "arbitrary"),
            vmem_limit_bytes=vmem_limit_bytes),
    )(mu_t, ls_t, muc_t, sigc_t)

    # Merge the per-core partials (logsumexp combine) and fold the softmax
    # denominator into a single additive offset for pass 2.
    m = jnp.max(m_parts, axis=0)                                          # [T, 1]
    l = jnp.sum(l_parts * jnp.exp(m_parts - m), axis=0)                   # [T, 1]
    offset = m + jnp.log(l)                                               # [T, 1]

    # ---- Pass 2: normalize each stored V block, emit lane-dense w^T / out^T ----
    w_t, out_t = pl.pallas_call(
        _pass2_kernel,
        out_shape=(jax.ShapeDtypeStruct((T, V), f32),
                   jax.ShapeDtypeStruct((D, V), f32)),
        grid=(nv,),
        in_specs=[
            pl.BlockSpec((T, 1), lambda i: (0, 0)),
            pl.BlockSpec((T, v_tile), lambda i: (0, i)),
            pl.BlockSpec((T, D), lambda i: (0, 0)),
        ],
        out_specs=(pl.BlockSpec((T, v_tile), lambda i: (0, i)),
                   pl.BlockSpec((D, v_tile), lambda i: (0, i))),
        compiler_params=pltpu.CompilerParams(
            dimension_semantics=("parallel",),
            vmem_limit_bytes=vmem_limit_bytes),
    )(offset, e_t, x)

    # TODO(synk): downstream code that can consume the lane-dense [T, V] / [D, V]
    # layouts directly should skip these transposes (one HBM pass each).
    return jnp.transpose(out_t), jnp.transpose(w_t)


def _reference(mu, log_sigma, mu_c, log_sigma_c, x):
    """Pure-JAX reference mirroring the PyTorch forward."""
    E = mu.shape[1]
    mu = jnp.clip(mu, -MU_CLAMP, MU_CLAMP)
    mu_c = jnp.clip(mu_c, -MU_CLAMP, MU_CLAMP)
    sigma = jnp.exp(jnp.clip(log_sigma, LOG_SIGMA_MIN, LOG_SIGMA_MAX))
    sigma_c = jnp.exp(jnp.clip(log_sigma_c, LOG_SIGMA_MIN, LOG_SIGMA_MAX))

    cols = []
    for i in range(mu_c.shape[0]):
        s = sigma + sigma_c[i, :]
        det_fac = jnp.sum(jnp.log(s), axis=1)
        diff_mu = jnp.sum((mu - mu_c[i, :]) ** 2 / s, axis=1)
        log_el = -0.5 * (det_fac + diff_mu + E * math.log(2.0 * math.pi))
        cols.append(jax.nn.softmax(log_el, axis=0))
    w = jnp.stack(cols, axis=1)
    return w @ x, w


if __name__ == "__main__":
    # Small synthetic shapes: vocab=512, topics=16, embed=32, feature dim=8.
    # v_tile=128 so the grid actually iterates (4 V blocks, 2-way pass-1 split).
    V, T, E, D = 512, 16, 32, 8

    key = jax.random.PRNGKey(0)
    k_mu, k_ls, k_muc, k_lsc, k_x = jax.random.split(key, 5)
    mu = jax.random.normal(k_mu, (V, E), dtype=jnp.float32)
    log_sigma = jax.random.normal(k_ls, (V, E), dtype=jnp.float32)
    mu_c = jax.random.normal(k_muc, (T, E), dtype=jnp.float32)
    log_sigma_c = jax.random.normal(k_lsc, (T, E), dtype=jnp.float32)
    x = jax.random.normal(k_x, (T, D), dtype=jnp.float32)

    out, w = gauss_softmax_etm(mu, log_sigma, mu_c, log_sigma_c, x, v_tile=128)
    jax.block_until_ready((out, w))

    ref_out, ref_w = _reference(mu, log_sigma, mu_c, log_sigma_c, x)
    assert out.shape == (V, D) and w.shape == (V, T)
    assert jnp.allclose(w, ref_w, atol=2e-5, rtol=1e-4), (
        float(jnp.max(jnp.abs(w - ref_w))))
    assert jnp.allclose(out, ref_out, atol=1e-4, rtol=1e-4), (
        float(jnp.max(jnp.abs(out - ref_out))))
    # Sanity: each topic column of w sums to 1.
    assert jnp.allclose(jnp.sum(w, axis=0), jnp.ones((T,)), atol=1e-4)

    print("KERNEL_OK")
</pallas_src>

<mosaic_0001>
module attributes {stable_mosaic.version = 11 : i64} {
  func.func @_pass1_kernel(%arg0: i32, %arg1: i32, %arg2: memref<32x128xf32, #tpu.memory_space<vmem>>, %arg3: memref<32x128xf32, #tpu.memory_space<vmem>>, %arg4: memref<32x16xf32, #tpu.memory_space<vmem>>, %arg5: memref<32x16xf32, #tpu.memory_space<vmem>>, %arg6: memref<16x128xf32, #tpu.memory_space<vmem>>, %arg7: memref<1x16x1xf32, #tpu.memory_space<vmem>>, %arg8: memref<1x16x1xf32, #tpu.memory_space<vmem>>) attributes {dimension_semantics = [#tpu.dimension_semantics<parallel>, #tpu.dimension_semantics<arbitrary>], iteration_bounds = array<i64: 2, 2>, scalar_prefetch = 0 : i64, scratch_operands = 0 : i64, tpu.core_type = #tpu.core_type<tc>, window_params = [{transform_indices = @transform_0, window_bounds = array<i64: 32, 128>}, {transform_indices = @transform_1, window_bounds = array<i64: 32, 128>}, {pipeline_mode = #tpu.pipeline_mode<synchronous>, transform_indices = @transform_2, window_bounds = array<i64: 32, 16>}, {pipeline_mode = #tpu.pipeline_mode<synchronous>, transform_indices = @transform_3, window_bounds = array<i64: 32, 16>}, {transform_indices = @transform_4, window_bounds = array<i64: 16, 128>}, {transform_indices = @transform_5, window_bounds = array<i64: 1, 16, 1>}, {transform_indices = @transform_6, window_bounds = array<i64: 1, 16, 1>}]} {
    %c0_i32 = arith.constant 0 : i32
    %0 = arith.cmpi eq, %arg1, %c0_i32 : i32
    %1 = arith.extui %0 : i1 to i32
    %c0_i32_0 = arith.constant 0 : i32
    %2 = arith.cmpi ne, %1, %c0_i32_0 : i32
    scf.if %2 {
      %cst_74 = arith.constant 0xFF800000 : f32
      %288 = vector.broadcast %cst_74 : f32 to vector<16x1xf32>
      %c0_75 = arith.constant 0 : index
      %c0_76 = arith.constant 0 : index
      %c0_77 = arith.constant 0 : index
      %289 = vector.load %arg7[%c0_75, %c0_76, %c0_77] : memref<1x16x1xf32, #tpu.memory_space<vmem>>, vector<1x16x1xf32>
      %290 = vector.shape_cast %289 : vector<1x16x1xf32> to vector<16x1xf32>
      %291 = vector.shape_cast %288 : vector<16x1xf32> to vector<1x16x1xf32>
      tpu.vector_store %arg7[%c0_75, %c0_76, %c0_77], %291 {strides = array<i32>} : memref<1x16x1xf32, #tpu.memory_space<vmem>>, vector<1x16x1xf32>,
      %cst_78 = arith.constant 0.000000e+00 : f32
      %292 = vector.broadcast %cst_78 : f32 to vector<16x1xf32>
      %c0_79 = arith.constant 0 : index
      %c0_80 = arith.constant 0 : index
      %c0_81 = arith.constant 0 : index
      %293 = vector.load %arg8[%c0_79, %c0_80, %c0_81] : memref<1x16x1xf32, #tpu.memory_space<vmem>>, vector<1x16x1xf32>
      %294 = vector.shape_cast %293 : vector<1x16x1xf32> to vector<16x1xf32>
      %295 = vector.shape_cast %292 : vector<16x1xf32> to vector<1x16x1xf32>
      tpu.vector_store %arg8[%c0_79, %c0_80, %c0_81], %295 {strides = array<i32>} : memref<1x16x1xf32, #tpu.memory_space<vmem>>, vector<1x16x1xf32>,
    } else {
    }
    %c0 = arith.constant 0 : index
    %c0_1 = arith.constant 0 : index
    %3 = vector.load %arg2[%c0, %c0_1] : memref<32x128xf32, #tpu.memory_space<vmem>>, vector<32x128xf32>
    %cst = arith.constant -1.41421354 : f32
    %cst_2 = arith.constant 1.41421354 : f32
    %4 = vector.broadcast %cst : f32 to vector<32x128xf32>
    %5 = arith.maximumf %4, %3 : vector<32x128xf32>
    %6 = vector.broadcast %cst_2 : f32 to vector<32x128xf32>
    %7 = arith.minimumf %6, %5 : vector<32x128xf32>
    %c0_3 = arith.constant 0 : index
    %c0_4 = arith.constant 0 : index
    %8 = vector.load %arg3[%c0_3, %c0_4] : memref<32x128xf32, #tpu.memory_space<vmem>>, vector<32x128xf32>
    %cst_5 = arith.constant -2.30258512 : f32
    %cst_6 = arith.constant 2.30258512 : f32
    %9 = vector.broadcast %cst_5 : f32 to vector<32x128xf32>
    %10 = arith.maximumf %9, %8 : vector<32x128xf32>
    %11 = vector.broadcast %cst_6 : f32 to vector<32x128xf32>
    %12 = arith.minimumf %11, %10 : vector<32x128xf32>
    %13 = math.exp %12 : vector<32x128xf32>
    %c0_7 = arith.constant 0 : index
    %c0_8 = arith.constant 0 : index
    %14 = vector.load %arg4[%c0_7, %c0_8] : memref<32x16xf32, #tpu.memory_space<vmem>>, vector<32x16xf32>
    %c0_9 = arith.constant 0 : index
    %c0_10 = arith.constant 0 : index
    %15 = vector.load %arg5[%c0_9, %c0_10] : memref<32x16xf32, #tpu.memory_space<vmem>>, vector<32x16xf32>
    %16 = vector.extract_strided_slice %15 {offsets = [0, 0], sizes = [32, 1], strides = [1, 1]} : vector<32x16xf32> to vector<32x1xf32>
    %17 = vector.broadcast %16 : vector<32x1xf32> to vector<32x128xf32>
    %18 = arith.addf %13, %17 : vector<32x128xf32>
    %19 = vector.extract_strided_slice %14 {offsets = [0, 0], sizes = [32, 1], strides = [1, 1]} : vector<32x16xf32> to vector<32x1xf32>
    %20 = vector.broadcast %19 : vector<32x1xf32> to vector<32x128xf32>
    %21 = arith.subf %7, %20 : vector<32x128xf32>
    %22 = math.log %18 : vector<32x128xf32>
    %23 = arith.mulf %21, %21 : vector<32x128xf32>
    %24 = arith.divf %23, %18 : vector<32x128xf32>
    %25 = arith.addf %22, %24 : vector<32x128xf32>
    %cst_11 = arith.constant dense<0.000000e+00> : vector<128xf32>
    %26 = vector.multi_reduction <add>, %25, %cst_11 [0] : vector<32x128xf32> to vector<128xf32>
    %27 = vector.shape_cast %26 : vector<128xf32> to vector<1x128xf32>
    %cst_12 = arith.constant -5.000000e-01 : f32
    %28 = vector.broadcast %cst_12 : f32 to vector<1x128xf32>
    %29 = arith.mulf %28, %27 : vector<1x128xf32>
    %30 = vector.extract_strided_slice %15 {offsets = [0, 1], sizes = [32, 1], strides = [1, 1]} : vector<32x16xf32> to vector<32x1xf32>
    %31 = vector.broadcast %30 : vector<32x1xf32> to vector<32x128xf32>
    %32 = arith.addf %13, %31 : vector<32x128xf32>
    %33 = vector.extract_strided_slice %14 {offsets = [0, 1], sizes = [32, 1], strides = [1, 1]} : vector<32x16xf32> to vector<32x1xf32>
    %34 = vector.broadcast %33 : vector<32x1xf32> to vector<32x128xf32>
    %35 = arith.subf %7, %34 : vector<32x128xf32>
    %36 = math.log %32 : vector<32x128xf32>
    %37 = arith.mulf %35, %35 : vector<32x128xf32>
    %38 = arith.divf %37, %32 : vector<32x128xf32>
    %39 = arith.addf %36, %38 : vector<32x128xf32>
    %cst_13 = arith.constant dense<0.000000e+00> : vector<128xf32>
    %40 = vector.multi_reduction <add>, %39, %cst_13 [0] : vector<32x128xf32> to vector<128xf32>
    %41 = vector.shape_cast %40 : vector<128xf32> to vector<1x128xf32>
    %cst_14 = arith.constant -5.000000e-01 : f32
    %42 = vector.broadcast %cst_14 : f32 to vector<1x128xf32>
    %43 = arith.mulf %42, %41 : vector<1x128xf32>
    %44 = vector.extract_strided_slice %15 {offsets = [0, 2], sizes = [32, 1], strides = [1, 1]} : vector<32x16xf32> to vector<32x1xf32>
    %45 = vector.broadcast %44 : vector<32x1xf32> to vector<32x128xf32>
    %46 = arith.addf %13, %45 : vector<32x128xf32>
    %47 = vector.extract_strided_slice %14 {offsets = [0, 2], sizes = [32, 1], strides = [1, 1]} : vector<32x16xf32> to vector<32x1xf32>
    %48 = vector.broadcast %47 : vector<32x1xf32> to vector<32x128xf32>
    %49 = arith.subf %7, %48 : vector<32x128xf32>
    %50 = math.log %46 : vector<32x128xf32>
    %51 = arith.mulf %49, %49 : vector<32x128xf32>
    %52 = arith.divf %51, %46 : vector<32x128xf32>
    %53 = arith.addf %50, %52 : vector<32x128xf32>
    %cst_15 = arith.constant dense<0.000000e+00> : vector<128xf32>
    %54 = vector.multi_reduction <add>, %53, %cst_15 [0] : vector<32x128xf32> to vector<128xf32>
    %55 = vector.shape_cast %54 : vector<128xf32> to vector<1x128xf32>
    %cst_16 = arith.constant -5.000000e-01 : f32
    %56 = vector.broadcast %cst_16 : f32 to vector<1x128xf32>
    %57 = arith.mulf %56, %55 : vector<1x128xf32>
    %58 = vector.extract_strided_slice %15 {offsets = [0, 3], sizes = [32, 1], strides = [1, 1]} : vector<32x16xf32> to vector<32x1xf32>
    %59 = vector.broadcast %58 : vector<32x1xf32> to vector<32x128xf32>
    %60 = arith.addf %13, %59 : vector<32x128xf32>
    %61 = vector.extract_strided_slice %14 {offsets = [0, 3], sizes = [32, 1], strides = [1, 1]} : vector<32x16xf32> to vector<32x1xf32>
    %62 = vector.broadcast %61 : vector<32x1xf32> to vector<32x128xf32>
    %63 = arith.subf %7, %62 : vector<32x128xf32>
    %64 = math.log %60 : vector<32x128xf32>
    %65 = arith.mulf %63, %63 : vector<32x128xf32>
    %66 = arith.divf %65, %60 : vector<32x128xf32>
    %67 = arith.addf %64, %66 : vector<32x128xf32>
    %cst_17 = arith.constant dense<0.000000e+00> : vector<128xf32>
    %68 = vector.multi_reduction <add>, %67, %cst_17 [0] : vector<32x128xf32> to vector<128xf32>
    %69 = vector.shape_cast %68 : vector<128xf32> to vector<1x128xf32>
    %cst_18 = arith.constant -5.000000e-01 : f32
    %70 = vector.broadcast %cst_18 : f32 to vector<1x128xf32>
    %71 = arith.mulf %70, %69 : vector<1x128xf32>
    %72 = vector.extract_strided_slice %15 {offsets = [0, 4], sizes = [32, 1], strides = [1, 1]} : vector<32x16xf32> to vector<32x1xf32>
    %73 = vector.broadcast %72 : vector<32x1xf32> to vector<32x128xf32>
    %74 = arith.addf %13, %73 : vector<32x128xf32>
    %75 = vector.extract_strided_slice %14 {offsets = [0, 4], sizes = [32, 1], strides = [1, 1]} : vector<32x16xf32> to vector<32x1xf32>
    %76 = vector.broadcast %75 : vector<32x1xf32> to vector<32x128xf32>
    %77 = arith.subf %7, %76 : vector<32x128xf32>
    %78 = math.log %74 : vector<32x128xf32>
    %79 = arith.mulf %77, %77 : vector<32x128xf32>
    %80 = arith.divf %79, %74 : vector<32x128xf32>
    %81 = arith.addf %78, %80 : vector<32x128xf32>
    %cst_19 = arith.constant dense<0.000000e+00> : vector<128xf32>
    %82 = vector.multi_reduction <add>, %81, %cst_19 [0] : vector<32x128xf32> to vector<128xf32>
    %83 = vector.shape_cast %82 : vector<128xf32> to vector<1x128xf32>
    %cst_20 = arith.constant -5.000000e-01 : f32
    %84 = vector.broadcast %cst_20 : f32 to vector<1x128xf32>
    %85 = arith.mulf %84, %83 : vector<1x128xf32>
    %86 = vector.extract_strided_slice %15 {offsets = [0, 5], sizes = [32, 1], strides = [1, 1]} : vector<32x16xf32> to vector<32x1xf32>
    %87 = vector.broadcast %86 : vector<32x1xf32> to vector<32x128xf32>
    %88 = arith.addf %13, %87 : vector<32x128xf32>
    %89 = vector.extract_strided_slice %14 {offsets = [0, 5], sizes = [32, 1], strides = [1, 1]} : vector<32x16xf32> to vector<32x1xf32>
    %90 = vector.broadcast %89 : vector<32x1xf32> to vector<32x128xf32>
    %91 = arith.subf %7, %90 : vector<32x128xf32>
    %92 = math.log %88 : vector<32x128xf32>
    %93 = arith.mulf %91, %91 : vector<32x128xf32>
    %94 = arith.divf %93, %88 : vector<32x128xf32>
    %95 = arith.addf %92, %94 : vector<32x128xf32>
    %cst_21 = arith.constant dense<0.000000e+00> : vector<128xf32>
    %96 = vector.multi_reduction <add>, %95, %cst_21 [0] : vector<32x128xf32> to vector<128xf32>
    %97 = vector.shape_cast %96 : vector<128xf32> to vector<1x128xf32>
    %cst_22 = arith.constant -5.000000e-01 : f32
    %98 = vector.broadcast %cst_22 : f32 to vector<1x128xf32>
    %99 = arith.mulf %98, %97 : vector<1x128xf32>
    %100 = vector.extract_strided_slice %15 {offsets = [0, 6], sizes = [32, 1], strides = [1, 1]} : vector<32x16xf32> to vector<32x1xf32>
    %101 = vector.broadcast %100 : vector<32x1xf32> to vector<32x128xf32>
    %102 = arith.addf %13, %101 : vector<32x128xf32>
    %103 = vector.extract_strided_slice %14 {offsets = [0, 6], sizes = [32, 1], strides = [1, 1]} : vector<32x16xf32> to vector<32x1xf32>
    %104 = vector.broadcast %103 : vector<32x1xf32> to vector<32x128xf32>
    %105 = arith.subf %7, %104 : vector<32x128xf32>
    %106 = math.log %102 : vector<32x128xf32>
    %107 = arith.mulf %105, %105 : vector<32x128xf32>
    %108 = arith.divf %107, %102 : vector<32x128xf32>
    %109 = arith.addf %106, %108 : vector<32x128xf32>
    %cst_23 = arith.constant dense<0.000000e+00> : vector<128xf32>
    %110 = vector.multi_reduction <add>, %109, %cst_23 [0] : vector<32x128xf32> to vector<128xf32>
    %111 = vector.shape_cast %110 : vector<128xf32> to vector<1x128xf32>
    %cst_24 = arith.constant -5.000000e-01 : f32
    %112 = vector.broadcast %cst_24 : f32 to vector<1x128xf32>
    %113 = arith.mulf %112, %111 : vector<1x128xf32>
    %114 = vector.extract_strided_slice %15 {offsets = [0, 7], sizes = [32, 1], strides = [1, 1]} : vector<32x16xf32> to vector<32x1xf32>
    %115 = vector.broadcast %114 : vector<32x1xf32> to vector<32x128xf32>
    %116 = arith.addf %13, %115 : vector<32x128xf32>
    %117 = vector.extract_strided_slice %14 {offsets = [0, 7], sizes = [32, 1], strides = [1, 1]} : vector<32x16xf32> to vector<32x1xf32>
    %118 = vector.broadcast %117 : vector<32x1xf32> to vector<32x128xf32>
    %119 = arith.subf %7, %118 : vector<32x128xf32>
    %120 = math.log %116 : vector<32x128xf32>
    %121 = arith.mulf %119, %119 : vector<32x128xf32>
    %122 = arith.divf %121, %116 : vector<32x128xf32>
    %123 = arith.addf %120, %122 : vector<32x128xf32>
    %cst_25 = arith.constant dense<0.000000e+00> : vector<128xf32>
    %124 = vector.multi_reduction <add>, %123, %cst_25 [0] : vector<32x128xf32> to vector<128xf32>
    %125 = vector.shape_cast %124 : vector<128xf32> to vector<1x128xf32>
    %cst_26 = arith.constant -5.000000e-01 : f32
    %126 = vector.broadcast %cst_26 : f32 to vector<1x128xf32>
    %127 = arith.mulf %126, %125 : vector<1x128xf32>
    %128 = tpu.concatenate %29, %43, %57, %71, %85, %99, %113, %127 in 0 : vector<1x128xf32>, vector<1x128xf32>, vector<1x128xf32>, vector<1x128xf32>, vector<1x128xf32>, vector<1x128xf32>, vector<1x128xf32>, vector<1x128xf32> -> vector<8x128xf32>
    %c0_27 = arith.constant 0 : index
    %c0_28 = arith.constant 0 : index
    %129 = vector.load %arg6[%c0_27, %c0_28] : memref<16x128xf32, #tpu.memory_space<vmem>>, vector<8x128xf32>
    tpu.vector_store %arg6[%c0_27, %c0_28], %128 {strides = array<i32>} : memref<16x128xf32, #tpu.memory_space<vmem>>, vector<8x128xf32>,
    %cst_29 = arith.constant dense<0xFF800000> : vector<8xf32>
    %130 = vector.multi_reduction <maximumf>, %128, %cst_29 [1] : vector<8x128xf32> to vector<8xf32>
    %131 = vector.shape_cast %130 : vector<8xf32> to vector<8x1xf32>
    %c0_30 = arith.constant 0 : index
    %c0_31 = arith.constant 0 : index
    %c0_32 = arith.constant 0 : index
    %132 = vector.load %arg7[%c0_30, %c0_31, %c0_32] : memref<1x16x1xf32, #tpu.memory_space<vmem>>, vector<1x8x1xf32>
    %133 = vector.shape_cast %132 : vector<1x8x1xf32> to vector<8x1xf32>
    %134 = arith.maximumf %133, %131 : vector<8x1xf32>
    %135 = vector.broadcast %134 : vector<8x1xf32> to vector<8x128xf32>
    %136 = arith.subf %128, %135 : vector<8x128xf32>
    %137 = math.exp %136 : vector<8x128xf32>
    %cst_33 = arith.constant dense<0.000000e+00> : vector<8xf32>
    %138 = vector.multi_reduction <add>, %137, %cst_33 [1] : vector<8x128xf32> to vector<8xf32>
    %139 = vector.shape_cast %138 : vector<8xf32> to vector<8x1xf32>
    %c0_34 = arith.constant 0 : index
    %c0_35 = arith.constant 0 : index
    %c0_36 = arith.constant 0 : index
    %140 = vector.load %arg8[%c0_34, %c0_35, %c0_36] : memref<1x16x1xf32, #tpu.memory_space<vmem>>, vector<1x8x1xf32>
    %141 = vector.shape_cast %140 : vector<1x8x1xf32> to vector<8x1xf32>
    %142 = arith.subf %133, %134 : vector<8x1xf32>
    %143 = math.exp %142 : vector<8x1xf32>
    %144 = arith.mulf %141, %143 : vector<8x1xf32>
    %145 = arith.addf %144, %139 : vector<8x1xf32>
    %c0_37 = arith.constant 0 : index
    %c0_38 = arith.constant 0 : index
    %c0_39 = arith.constant 0 : index
    %146 = vector.load %arg8[%c0_37, %c0_38, %c0_39] : memref<1x16x1xf32, #tpu.memory_space<vmem>>, vector<1x8x1xf32>
    %147 = vector.shape_cast %146 : vector<1x8x1xf32> to vector<8x1xf32>
    %148 = vector.shape_cast %145 : vector<8x1xf32> to vector<1x8x1xf32>
    tpu.vector_store %arg8[%c0_37, %c0_38, %c0_39], %148 {strides = array<i32>} : memref<1x16x1xf32, #tpu.memory_space<vmem>>, vector<1x8x1xf32>,
    %c0_40 = arith.constant 0 : index
    %c0_41 = arith.constant 0 : index
    %c0_42 = arith.constant 0 : index
    %149 = vector.load %arg7[%c0_40, %c0_41, %c0_42] : memref<1x16x1xf32, #tpu.memory_space<vmem>>, vector<1x8x1xf32>
    %150 = vector.shape_cast %149 : vector<1x8x1xf32> to vector<8x1xf32>
    %151 = vector.shape_cast %134 : vector<8x1xf32> to vector<1x8x1xf32>
    tpu.vector_store %arg7[%c0_40, %c0_41, %c0_42], %151 {strides = array<i32>} : memref<1x16x1xf32, #tpu.memory_space<vmem>>, vector<1x8x1xf32>,
    %152 = vector.extract_strided_slice %15 {offsets = [0, 8], sizes = [32, 1], strides = [1, 1]} : vector<32x16xf32> to vector<32x1xf32>
    %153 = vector.broadcast %152 : vector<32x1xf32> to vector<32x128xf32>
    %154 = arith.addf %13, %153 : vector<32x128xf32>
    %155 = vector.extract_strided_slice %14 {offsets = [0, 8], sizes = [32, 1], strides = [1, 1]} : vector<32x16xf32> to vector<32x1xf32>
    %156 = vector.broadcast %155 : vector<32x1xf32> to vector<32x128xf32>
    %157 = arith.subf %7, %156 : vector<32x128xf32>
    %158 = math.log %154 : vector<32x128xf32>
    %159 = arith.mulf %157, %157 : vector<32x128xf32>
    %160 = arith.divf %159, %154 : vector<32x128xf32>
    %161 = arith.addf %158, %160 : vector<32x128xf32>
    %cst_43 = arith.constant dense<0.000000e+00> : vector<128xf32>
    %162 = vector.multi_reduction <add>, %161, %cst_43 [0] : vector<32x128xf32> to vector<128xf32>
    %163 = vector.shape_cast %162 : vector<128xf32> to vector<1x128xf32>
    %cst_44 = arith.constant -5.000000e-01 : f32
    %164 = vector.broadcast %cst_44 : f32 to vector<1x128xf32>
    %165 = arith.mulf %164, %163 : vector<1x128xf32>
    %166 = vector.extract_strided_slice %15 {offsets = [0, 9], sizes = [32, 1], strides = [1, 1]} : vector<32x16xf32> to vector<32x1xf32>
    %167 = vector.broadcast %166 : vector<32x1xf32> to vector<32x128xf32>
    %168 = arith.addf %13, %167 : vector<32x128xf32>
    %169 = vector.extract_strided_slice %14 {offsets = [0, 9], sizes = [32, 1], strides = [1, 1]} : vector<32x16xf32> to vector<32x1xf32>
    %170 = vector.broadcast %169 : vector<32x1xf32> to vector<32x128xf32>
    %171 = arith.subf %7, %170 : vector<32x128xf32>
    %172 = math.log %168 : vector<32x128xf32>
    %173 = arith.mulf %171, %171 : vector<32x128xf32>
    %174 = arith.divf %173, %168 : vector<32x128xf32>
    %175 = arith.addf %172, %174 : vector<32x128xf32>
    %cst_45 = arith.constant dense<0.000000e+00> : vector<128xf32>
    %176 = vector.multi_reduction <add>, %175, %cst_45 [0] : vector<32x128xf32> to vector<128xf32>
    %177 = vector.shape_cast %176 : vector<128xf32> to vector<1x128xf32>
    %cst_46 = arith.constant -5.000000e-01 : f32
    %178 = vector.broadcast %cst_46 : f32 to vector<1x128xf32>
    %179 = arith.mulf %178, %177 : vector<1x128xf32>
    %180 = vector.extract_strided_slice %15 {offsets = [0, 10], sizes = [32, 1], strides = [1, 1]} : vector<32x16xf32> to vector<32x1xf32>
    %181 = vector.broadcast %180 : vector<32x1xf32> to vector<32x128xf32>
    %182 = arith.addf %13, %181 : vector<32x128xf32>
    %183 = vector.extract_strided_slice %14 {offsets = [0, 10], sizes = [32, 1], strides = [1, 1]} : vector<32x16xf32> to vector<32x1xf32>
    %184 = vector.broadcast %183 : vector<32x1xf32> to vector<32x128xf32>
    %185 = arith.subf %7, %184 : vector<32x128xf32>
    %186 = math.log %182 : vector<32x128xf32>
    %187 = arith.mulf %185, %185 : vector<32x128xf32>
    %188 = arith.divf %187, %182 : vector<32x128xf32>
    %189 = arith.addf %186, %188 : vector<32x128xf32>
    %cst_47 = arith.constant dense<0.000000e+00> : vector<128xf32>
    %190 = vector.multi_reduction <add>, %189, %cst_47 [0] : vector<32x128xf32> to vector<128xf32>
    %191 = vector.shape_cast %190 : vector<128xf32> to vector<1x128xf32>
    %cst_48 = arith.constant -5.000000e-01 : f32
    %192 = vector.broadcast %cst_48 : f32 to vector<1x128xf32>
    %193 = arith.mulf %192, %191 : vector<1x128xf32>
    %194 = vector.extract_strided_slice %15 {offsets = [0, 11], sizes = [32, 1], strides = [1, 1]} : vector<32x16xf32> to vector<32x1xf32>
    %195 = vector.broadcast %194 : vector<32x1xf32> to vector<32x128xf32>
    %196 = arith.addf %13, %195 : vector<32x128xf32>
    %197 = vector.extract_strided_slice %14 {offsets = [0, 11], sizes = [32, 1], strides = [1, 1]} : vector<32x16xf32> to vector<32x1xf32>
    %198 = vector.broadcast %197 : vector<32x1xf32> to vector<32x128xf32>
    %199 = arith.subf %7, %198 : vector<32x128xf32>
    %200 = math.log %196 : vector<32x128xf32>
    %201 = arith.mulf %199, %199 : vector<32x128xf32>
    %202 = arith.divf %201, %196 : vector<32x128xf32>
    %203 = arith.addf %200, %202 : vector<32x128xf32>
    %cst_49 = arith.constant dense<0.000000e+00> : vector<128xf32>
    %204 = vector.multi_reduction <add>, %203, %cst_49 [0] : vector<32x128xf32> to vector<128xf32>
    %205 = vector.shape_cast %204 : vector<128xf32> to vector<1x128xf32>
    %cst_50 = arith.constant -5.000000e-01 : f32
    %206 = vector.broadcast %cst_50 : f32 to vector<1x128xf32>
    %207 = arith.mulf %206, %205 : vector<1x128xf32>
    %208 = vector.extract_strided_slice %15 {offsets = [0, 12], sizes = [32, 1], strides = [1, 1]} : vector<32x16xf32> to vector<32x1xf32>
    %209 = vector.broadcast %208 : vector<32x1xf32> to vector<32x128xf32>
    %210 = arith.addf %13, %209 : vector<32x128xf32>
    %211 = vector.extract_strided_slice %14 {offsets = [0, 12], sizes = [32, 1], strides = [1, 1]} : vector<32x16xf32> to vector<32x1xf32>
    %212 = vector.broadcast %211 : vector<32x1xf32> to vector<32x128xf32>
    %213 = arith.subf %7, %212 : vector<32x128xf32>
    %214 = math.log %210 : vector<32x128xf32>
    %215 = arith.mulf %213, %213 : vector<32x128xf32>
    %216 = arith.divf %215, %210 : vector<32x128xf32>
    %217 = arith.addf %214, %216 : vector<32x128xf32>
    %cst_51 = arith.constant dense<0.000000e+00> : vector<128xf32>
    %218 = vector.multi_reduction <add>, %217, %cst_51 [0] : vector<32x128xf32> to vector<128xf32>
    %219 = vector.shape_cast %218 : vector<128xf32> to vector<1x128xf32>
    %cst_52 = arith.constant -5.000000e-01 : f32
    %220 = vector.broadcast %cst_52 : f32 to vector<1x128xf32>
    %221 = arith.mulf %220, %219 : vector<1x128xf32>
    %222 = vector.extract_strided_slice %15 {offsets = [0, 13], sizes = [32, 1], strides = [1, 1]} : vector<32x16xf32> to vector<32x1xf32>
    %223 = vector.broadcast %222 : vector<32x1xf32> to vector<32x128xf32>
    %224 = arith.addf %13, %223 : vector<32x128xf32>
    %225 = vector.extract_strided_slice %14 {offsets = [0, 13], sizes = [32, 1], strides = [1, 1]} : vector<32x16xf32> to vector<32x1xf32>
    %226 = vector.broadcast %225 : vector<32x1xf32> to vector<32x128xf32>
    %227 = arith.subf %7, %226 : vector<32x128xf32>
    %228 = math.log %224 : vector<32x128xf32>
    %229 = arith.mulf %227, %227 : vector<32x128xf32>
    %230 = arith.divf %229, %224 : vector<32x128xf32>
    %231 = arith.addf %228, %230 : vector<32x128xf32>
    %cst_53 = arith.constant dense<0.000000e+00> : vector<128xf32>
    %232 = vector.multi_reduction <add>, %231, %cst_53 [0] : vector<32x128xf32> to vector<128xf32>
    %233 = vector.shape_cast %232 : vector<128xf32> to vector<1x128xf32>
    %cst_54 = arith.constant -5.000000e-01 : f32
    %234 = vector.broadcast %cst_54 : f32 to vector<1x128xf32>
    %235 = arith.mulf %234, %233 : vector<1x128xf32>
    %236 = vector.extract_strided_slice %15 {offsets = [0, 14], sizes = [32, 1], strides = [1, 1]} : vector<32x16xf32> to vector<32x1xf32>
    %237 = vector.broadcast %236 : vector<32x1xf32> to vector<32x128xf32>
    %238 = arith.addf %13, %237 : vector<32x128xf32>
    %239 = vector.extract_strided_slice %14 {offsets = [0, 14], sizes = [32, 1], strides = [1, 1]} : vector<32x16xf32> to vector<32x1xf32>
    %240 = vector.broadcast %239 : vector<32x1xf32> to vector<32x128xf32>
    %241 = arith.subf %7, %240 : vector<32x128xf32>
    %242 = math.log %238 : vector<32x128xf32>
    %243 = arith.mulf %241, %241 : vector<32x128xf32>
    %244 = arith.divf %243, %238 : vector<32x128xf32>
    %245 = arith.addf %242, %244 : vector<32x128xf32>
    %cst_55 = arith.constant dense<0.000000e+00> : vector<128xf32>
    %246 = vector.multi_reduction <add>, %245, %cst_55 [0] : vector<32x128xf32> to vector<128xf32>
    %247 = vector.shape_cast %246 : vector<128xf32> to vector<1x128xf32>
    %cst_56 = arith.constant -5.000000e-01 : f32
    %248 = vector.broadcast %cst_56 : f32 to vector<1x128xf32>
    %249 = arith.mulf %248, %247 : vector<1x128xf32>
    %250 = vector.extract_strided_slice %15 {offsets = [0, 15], sizes = [32, 1], strides = [1, 1]} : vector<32x16xf32> to vector<32x1xf32>
    %251 = vector.broadcast %250 : vector<32x1xf32> to vector<32x128xf32>
    %252 = arith.addf %13, %251 : vector<32x128xf32>
    %253 = vector.extract_strided_slice %14 {offsets = [0, 15], sizes = [32, 1], strides = [1, 1]} : vector<32x16xf32> to vector<32x1xf32>
    %254 = vector.broadcast %253 : vector<32x1xf32> to vector<32x128xf32>
    %255 = arith.subf %7, %254 : vector<32x128xf32>
    %256 = math.log %252 : vector<32x128xf32>
    %257 = arith.mulf %255, %255 : vector<32x128xf32>
    %258 = arith.divf %257, %252 : vector<32x128xf32>
    %259 = arith.addf %256, %258 : vector<32x128xf32>
    %cst_57 = arith.constant dense<0.000000e+00> : vector<128xf32>
    %260 = vector.multi_reduction <add>, %259, %cst_57 [0] : vector<32x128xf32> to vector<128xf32>
    %261 = vector.shape_cast %260 : vector<128xf32> to vector<1x128xf32>
    %cst_58 = arith.constant -5.000000e-01 : f32
    %262 = vector.broadcast %cst_58 : f32 to vector<1x128xf32>
    %263 = arith.mulf %262, %261 : vector<1x128xf32>
    %264 = tpu.concatenate %165, %179, %193, %207, %221, %235, %249, %263 in 0 : vector<1x128xf32>, vector<1x128xf32>, vector<1x128xf32>, vector<1x128xf32>, vector<1x128xf32>, vector<1x128xf32>, vector<1x128xf32>, vector<1x128xf32> -> vector<8x128xf32>
    %c8 = arith.constant 8 : index
    %c0_59 = arith.constant 0 : index
    %265 = vector.load %arg6[%c8, %c0_59] : memref<16x128xf32, #tpu.memory_space<vmem>>, vector<8x128xf32>
    tpu.vector_store %arg6[%c8, %c0_59], %264 {strides = array<i32>} : memref<16x128xf32, #tpu.memory_space<vmem>>, vector<8x128xf32>,
    %cst_60 = arith.constant dense<0xFF800000> : vector<8xf32>
    %266 = vector.multi_reduction <maximumf>, %264, %cst_60 [1] : vector<8x128xf32> to vector<8xf32>
    %267 = vector.shape_cast %266 : vector<8xf32> to vector<8x1xf32>
    %c0_61 = arith.constant 0 : index
    %c8_62 = arith.constant 8 : index
    %c0_63 = arith.constant 0 : index
    %268 = vector.load %arg7[%c0_61, %c8_62, %c0_63] : memref<1x16x1xf32, #tpu.memory_space<vmem>>, vector<1x8x1xf32>
    %269 = vector.shape_cast %268 : vector<1x8x1xf32> to vector<8x1xf32>
    %270 = arith.maximumf %269, %267 : vector<8x1xf32>
    %271 = vector.broadcast %270 : vector<8x1xf32> to vector<8x128xf32>
    %272 = arith.subf %264, %271 : vector<8x128xf32>
    %273 = math.exp %272 : vector<8x128xf32>
    %cst_64 = arith.constant dense<0.000000e+00> : vector<8xf32>
    %274 = vector.multi_reduction <add>, %273, %cst_64 [1] : vector<8x128xf32> to vector<8xf32>
    %275 = vector.shape_cast %274 : vector<8xf32> to vector<8x1xf32>
    %c0_65 = arith.constant 0 : index
    %c8_66 = arith.constant 8 : index
    %c0_67 = arith.constant 0 : index
    %276 = vector.load %arg8[%c0_65, %c8_66, %c0_67] : memref<1x16x1xf32, #tpu.memory_space<vmem>>, vector<1x8x1xf32>
    %277 = vector.shape_cast %276 : vector<1x8x1xf32> to vector<8x1xf32>
    %278 = arith.subf %269, %270 : vector<8x1xf32>
    %279 = math.exp %278 : vector<8x1xf32>
    %280 = arith.mulf %277, %279 : vector<8x1xf32>
    %281 = arith.addf %280, %275 : vector<8x1xf32>
    %c0_68 = arith.constant 0 : index
    %c8_69 = arith.constant 8 : index
    %c0_70 = arith.constant 0 : index
    %282 = vector.load %arg8[%c0_68, %c8_69, %c0_70] : memref<1x16x1xf32, #tpu.memory_space<vmem>>, vector<1x8x1xf32>
    %283 = vector.shape_cast %282 : vector<1x8x1xf32> to vector<8x1xf32>
    %284 = vector.shape_cast %281 : vector<8x1xf32> to vector<1x8x1xf32>
    tpu.vector_store %arg8[%c0_68, %c8_69, %c0_70], %284 {strides = array<i32>} : memref<1x16x1xf32, #tpu.memory_space<vmem>>, vector<1x8x1xf32>,
    %c0_71 = arith.constant 0 : index
    %c8_72 = arith.constant 8 : index
    %c0_73 = arith.constant 0 : index
    %285 = vector.load %arg7[%c0_71, %c8_72, %c0_73] : memref<1x16x1xf32, #tpu.memory_space<vmem>>, vector<1x8x1xf32>
    %286 = vector.shape_cast %285 : vector<1x8x1xf32> to vector<8x1xf32>
    %287 = vector.shape_cast %270 : vector<8x1xf32> to vector<1x8x1xf32>
    tpu.vector_store %arg7[%c0_71, %c8_72, %c0_73], %287 {strides = array<i32>} : memref<1x16x1xf32, #tpu.memory_space<vmem>>, vector<1x8x1xf32>,
    return
  }
  func.func @transform_0(%arg0: i32, %arg1: i32) -> (i32, i32) {
    %c2_i32 = arith.constant 2 : i32
    %0 = arith.muli %arg0, %c2_i32 : i32
    %1 = arith.addi %0, %arg1 : i32
    %c0_i32 = arith.constant 0 : i32
    %c0_i32_0 = arith.constant 0 : i32
    return %c0_i32, %1 : i32, i32
  }
  func.func @transform_1(%arg0: i32, %arg1: i32) -> (i32, i32) {
    %c2_i32 = arith.constant 2 : i32
    %0 = arith.muli %arg0, %c2_i32 : i32
    %1 = arith.addi %0, %arg1 : i32
    %c0_i32 = arith.constant 0 : i32
    %c0_i32_0 = arith.constant 0 : i32
    return %c0_i32, %1 : i32, i32
  }
  func.func @transform_2(%arg0: i32, %arg1: i32) -> (i32, i32) {
    %c0_i32 = arith.constant 0 : i32
    %c0_i32_0 = arith.constant 0 : i32
    %c0_i32_1 = arith.constant 0 : i32
    return %c0_i32, %c0_i32_0 : i32, i32
  }
  func.func @transform_3(%arg0: i32, %arg1: i32) -> (i32, i32) {
    %c0_i32 = arith.constant 0 : i32
    %c0_i32_0 = arith.constant 0 : i32
    %c0_i32_1 = arith.constant 0 : i32
    return %c0_i32, %c0_i32_0 : i32, i32
  }
  func.func @transform_4(%arg0: i32, %arg1: i32) -> (i32, i32) {
    %c2_i32 = arith.constant 2 : i32
    %0 = arith.muli %arg0, %c2_i32 : i32
    %1 = arith.addi %0, %arg1 : i32
    %c0_i32 = arith.constant 0 : i32
    %c0_i32_0 = arith.constant 0 : i32
    return %c0_i32, %1 : i32, i32
  }
  func.func @transform_5(%arg0: i32, %arg1: i32) -> (i32, i32, i32) {
    %c0_i32 = arith.constant 0 : i32
    %c0_i32_0 = arith.constant 0 : i32
    %c0_i32_1 = arith.constant 0 : i32
    return %arg0, %c0_i32, %c0_i32_0 : i32, i32, i32
  }
  func.func @transform_6(%arg0: i32, %arg1: i32) -> (i32, i32, i32) {
    %c0_i32 = arith.constant 0 : i32
    %c0_i32_0 = arith.constant 0 : i32
    %c0_i32_1 = arith.constant 0 : i32
    return %arg0, %c0_i32, %c0_i32_0 : i32, i32, i32
  }
}

</mosaic_0001>

<bundles_post_ra>
// kernel: tpu_custom_call.1
= control target key start
LH: loop header
LB: loop body
LE: loop exit
PB: predicated region body
PF: predicated region fallthrough
CT: control target
= control target key end

     0   :  { %s3941_s0 = inlined_call_operand.hbm [shape: f32[32,512], index: 0, kind: input, shape index: {}]   ;;  %s3942_s1 = inlined_call_operand.hbm [shape: f32[32,512], index: 1, kind: input, shape index: {}]   ;;  %s3943_s2 = inlined_call_operand.hbm [shape: f32[32,16], index: 2, kind: input, shape index: {}]   ;;  %s3944_s3 = inlined_call_operand.hbm [shape: f32[32,16], index: 3, kind: input, shape index: {}]   ;;  %s3945_s4 = inlined_call_operand.hbm [shape: f32[16,512], index: 4, kind: output, shape index: {0}]   ;;  %s3946_s5 = inlined_call_operand.hbm [shape: f32[2,16,1], index: 5, kind: output, shape index: {1}]   ;;  %s3947_s6 = inlined_call_operand.hbm [shape: f32[2,16,1], index: 6, kind: output, shape index: {2}]  }
   0x1   :  { %3975 = sst [smem:[#allocation29_spill]] %s3941_s0 }
   0x2   :  { %3976 = sst [smem:[#allocation30_spill]] %s3942_s1 }
   0x3   :  { %3977 = sst [smem:[#allocation31_spill]] %s3943_s2 }
   0x4   :  { %3978 = sst [smem:[#allocation32_spill]] %s3944_s3 }
   0x5   :  { %3979 = sst [smem:[#allocation33_spill]] %s3945_s4 }
   0x6   :  { %3980 = sst [smem:[#allocation34_spill]] %s3946_s5 }
   0x7   :  { %3981 = sst [smem:[#allocation35_spill]] %s3947_s6 }
   0x8   :  { %12 = vsyncpa [#allocation3], 0 }
   0x9   :  { %14 = vsyncpa [#allocation3 + $0x1], 0 }
   0xa   :  { %15 = vsyncpa [#allocation6], 0 }
   0xb   :  { %17 = vsyncpa [#allocation6 + $0x1], 0 }
   0xc   :  { %18 = vsyncpa [#allocation9], 0 }
   0xd   :  { %19 = vsyncpa [#allocation4], 0 }
   0xe   :  { %21 = vsyncpa [#allocation4 + $0x1], 0 }
   0xf   :  { %22 = vsyncpa [#allocation12], 0 }
  0x10   :  { %24 = vsyncpa [#allocation12 + $0x1], 0  ;;  %s2882_s21 = smov 0   ;;  %s2884_s22 = smov 0  }
  0x11   :  { %s2886_s23 = smov 0   ;;  %s2888_s24 = smov 0  }
  0x12   :  { %s2890_s25 = smov 0   ;;  %s2892_s26 = smov 0  }
  0x13   :  { %s2894_s27 = smov 0   ;;  %s2896_s28 = smov 0  }
  0x14   :  { %s2898_s29 = smov 0   ;;  %s2900_s30 = smov 0  }
  0x15   :  { %s2902_s7 = smov 0  }
  0x16 LB: > { %3982 = sst [smem:[#allocation20_spill]] %s2786_s24  ;;  %s2936_s8 = sadd.s32 4294967295, %s2814_s7   ;;  %s2814_s7 = sphi %s2902_s7, %s30_s7   ;;  %s2810_s30 = sphi %s2900_s30, %s4042_s30   ;;  %s2806_s29 = sphi %s2898_s29, %s4033_s29   ;;  %s2802_s28 = sphi %s2896_s28, %s4041_s28   ;;  %s2798_s27 = sphi %s2894_s27, %s4032_s27   ;;  %s2794_s26 = sphi %s2892_s26, %s4040_s26   ;;  %s2790_s25 = sphi %s2890_s25, %s4039_s25   ;;  %s2786_s24 = sphi %s2888_s24, %s4038_s24   ;;  %s2782_s23 = sphi %s2886_s23, %s4037_s23   ;;  %s2778_s22 = sphi %s2884_s22, %s4036_s22   ;;  %s2774_s21 = sphi %s2882_s21, %s4035_s21  }
  0x17   : > { %3983 = sst [smem:[#allocation21_spill]] %s2802_s28  ;;  %s3949_s9 = sadd.s32 4294967294, %s2814_s7  }
  0x18   : > { %3984 = sst [smem:[#allocation22_spill]] %s2806_s29  ;;  %p60_p0 = scmp.ne.s32.totalorder %s2794_s26, %s2790_s25 }
  0x19   : > { %p61_p1 = scmp.eq.s32.totalorder %s2814_s7, 0  ;;  %p66_p2 = scmp.ne.s32.totalorder %s2790_s25, %s2786_s24 }
  0x1a   : > { %p3948_p3 = scmp.eq.s32.totalorder %s2936_s8, 0  ;;  %p166_p5 = scmp.eq.s32.totalorder %s2936_s8, 3 }
  0x1b   : > { %p2945_p4 = por %p61_p1, %p60_p0  ;;  %p172_p7 = scmp.eq.s32.totalorder %s3949_s9, 3 }
  0x1c   : > { %p2952_p6 = por %p3948_p3, %p66_p2  ;;  %p2958_p8 = por %p166_p5, %p60_p0 }
  0x1d   : > { %p2963_p9 = por %p172_p7, %p66_p2  ;;  %p191_p10 = scmp.ne.s32.totalorder %s2782_s23, %s2778_s22 }
  0x1e   : > { %s3986_s11 = scalar_select %p2952_p6, 1, 0 }
  0x1f   : > { %s3987_s12 = scalar_select %p2958_p8, 1, 0 }
  0x20   : > { %s3989_s14 = scalar_select %p2963_p9, 1, 0 }
  0x21   : > { %3988 = sst [smem:[#allocation23_spill]] %s3987_s12  ;;  %p197_p11 = scmp.ne.s32.totalorder %s2778_s22, %s2774_s21 }
  0x22   : > { %3990 = sst [smem:[#allocation24_spill]] %s3989_s14  ;;  %p1956_p12 = scmp.ge.s32.totalorder %s2814_s7, 1 }
  0x23   : > { %p2971_p13 = por %p191_p10, %p166_p5  ;;  %p231_p1 = scmp.lt.s32.totalorder %s2814_s7, 5 }
  0x24   : > { %p2976_p3 = por %p197_p11, %p172_p7  ;;  %s2816_s18 = smov [#allocation7]  }
  0x25   : > { %s3991_s15 = scalar_select %p2971_p13, 1, 0 }
  0x26   : > { %s3993_s16 = scalar_select %p2976_p3, 1, 0 }
  0x27   : > { %3992 = sst [smem:[#allocation25_spill]] %s3991_s15  ;;  %p2980_p0 = pnand %p1956_p12, %p231_p1 }
  0x28   : > { %3994 = sst [smem:[#allocation26_spill]] %s3993_s16  ;;  %s243_s19 = sshll.u32 %s2816_s18, 4  ;;  %s244_s19 = int_to_ptr.vmem [resolvable:$true] %s243_s19 }
  0x29   : > { %s3995_s17 = scalar_select %p2980_p0, 1, 0 }
  0x2a   : > { %p2014_p2 = pneg %p2980_p0  ;;  %p3996_p9 = scmp.eq.s32.totalorder %s2936_s8, 0 }
  0x2b   : > { %p2040_p7 = scmp.lt.s32.totalorder %s2814_s7, 4  ;;  %s3999_s2 = sld [smem:[#allocation31_spill]] }
  0x2c   : > { %p2988_p5 = pnand %p2014_p2, %p3996_p9 }
  0x2d   : > { %p2995_p10 = pnand %p2040_p7, %p2945_p4 }
  0x2e   : > { %p2506_p9 = pneg %p2988_p5 }
  0x2f   : > { %s3998_s21 = scalar_select %p2995_p10, 1, 0 }
  0x31   : > { %s2504_s18 = scalar_lea.hbm %s3999_s2, 512 }
  0x32   : > { %p2505_p11 = scmp.ne.s32.totalorder %s3999_s2, %s2504_s18  ;;  %p2511_p4 = scmp.lt.u32.totalorder %s2504_s18, %s3999_s2 }
  0x34   : > { %p2507_p12 = pnand %p2506_p9, %p2505_p11 }
  0x36   : > { %p2508_p1 = pneg %p2507_p12 }
  0x38   : > { %p2513_p2 = pnand %p2511_p4, %p2508_p1 }
  0x3a   : > { %2516 = shalt.err (!%p2513_p2)
}
  0x3b   : > { %s2517_s6 = scalar_lea.vmem %s244_s19, 512  ;;  %p2525_p13 = scmp.lt.s32.totalorder %s244_s19, %s244_s19 }
  0x3c   : > { %p2518_p7 = scmp.ne.s32.totalorder %s244_s19, %s2517_s6  ;;  %p2526_p6 = scmp.lt.s32.totalorder %s2517_s6, %s2517_s6 }
  0x3e   : > { %p2520_p3 = pnand %p2518_p7, %p2506_p9  ;;  %p2527_p0 = por %p2526_p6, %p2525_p13 }
  0x40   : > { %p2521_p8 = pneg %p2520_p3 }
  0x42   : > { %p2528_p10 = pnand %p2527_p0, %p2521_p8 }
  0x44   : > { %2531 = shalt.err (!%p2528_p10)
}
  0x45   : > { %s3966_s9 = smov 128   ;;  %s3968_s13 = smov 8  }
  0x46   : > { %2017 = dma.hbm_to_vmem [thread:$0]  (!%p2988_p5), %s3999_s2, 512, %s244_s19, [#allocation6], %s3966_s9, %s3966_s9, %s3968_s13  }
  0x47   : > { %s2819_s16 = smov [#allocation8]   ;;  %s4000_s3 = sld [smem:[#allocation32_spill]] }
  0x48   : > { %s256_s18 = sshll.u32 %s2819_s16, 4  ;;  %s257_s18 = int_to_ptr.vmem [resolvable:$true] %s256_s18 }
  0x4d   : > { %s2532_s4 = scalar_lea.hbm %s4000_s3, 512 }
  0x4e   : > { %p2533_p3 = scmp.ne.s32.totalorder %s4000_s3, %s2532_s4  ;;  %p2539_p13 = scmp.lt.u32.totalorder %s2532_s4, %s4000_s3 }
  0x50   : > { %p2535_p6 = pnand %p2533_p3, %p2506_p9 }
  0x52   : > { %p2536_p8 = pneg %p2535_p6 }
  0x54   : > { %p2541_p0 = pnand %p2539_p13, %p2536_p8 }
  0x56   : > { %2544 = shalt.err (!%p2541_p0)
}
  0x57   : > { %s2545_s19 = scalar_lea.vmem %s257_s18, 512  ;;  %p2553_p1 = scmp.lt.s32.totalorder %s257_s18, %s257_s18 }
  0x58   : > { %p2546_p10 = scmp.ne.s32.totalorder %s257_s18, %s2545_s19  ;;  %p2554_p4 = scmp.lt.s32.totalorder %s2545_s19, %s2545_s19 }
  0x5a   : > { %p2548_p11 = pnand %p2546_p10, %p2506_p9  ;;  %p2555_p2 = por %p2554_p4, %p2553_p1 }
  0x5c   : > { %p2549_p12 = pneg %p2548_p11 }
  0x5e   : > { %p2556_p7 = pnand %p2555_p2, %p2549_p12 }
  0x60   : > { %2559 = shalt.err (!%p2556_p7)
}
  0x61   : > { %2020 = dma.hbm_to_vmem [thread:$0]  (!%p2988_p5), %s4000_s3, 512, %s257_s18, [#allocation9], %s3966_s9, %s3966_s9, %s3968_s13  }
  0x62   : > { %s39_s28 = sadd.s32 1, %s2806_s29  ;;  %s42_s12 = sadd.s32 1, %s2810_s30 }
  0x63   : > { %p40_p9 = scmp.ge.s32.totalorder %s39_s28, 2  ;;  %s1950_s15 = sshll.u32 %s2810_s30, 1 }
  0x64   : > { %s3051_s20 = sadd.s32 %s2806_s29, %s1950_s15  ;;  %s53_s24 = sadd.s32 1, %s2794_s26 }
  0x65   : > { %s4044_s28 = smov (%p40_p9, %s39_s28), 0  ;;  %s4046_s12 = smov (!%p40_p9, %s42_s12), %s2810_s30 }
  0x66   : > { %4001 = sst [smem:[#allocation27_spill]] %s4044_s28  ;;  %s270_s14 = sand.u32 1, %s2794_s26  }
  0x67   : > { %s3970_s16 = sshll.u32 %s3051_s20, 7  ;;  %p44_p5 = scmp.ge.s32.totalorder %s4046_s12, 2 }
  0x68   : > { %s3059_s18 = sshll.u32 %s270_s14, 5  ;;  %s4002_s0 = sld [smem:[#allocation29_spill]] }
  0x69   : > { %s4048_s12 = smov (%p44_p5, %s4046_s12), 0  ;;  %s274_s13 = scalar_lea.vmem [#allocation2], %s3059_s18 }
  0x6a   : > { %4003 = sst [smem:[#allocation28_spill]] %s4048_s12  ;;  %s1951_s4 = sshll.u32 %s4048_s12, 1 }
  0x6b   : > { %s178_s5 = ssub.s32 %s2810_s30, %s4048_s12  ;;  %s49_s15 = sadd.s32 %s1951_s4, %s4044_s28 }
  0x6c   : > { %p179_p3 = scmp.eq.s32.totalorder %s178_s5, 0  ;;  %s50_s9 = ssub.s32 %s3051_s20, %s49_s15 }
  0x6d   : > { %s282_s10 = sshll.u32 %s274_s13, 4  ;;  %p51_p6 = scmp.eq.s32.totalorder %s50_s9, 0  ;;  %s3076_s10 = int_to_ptr.vmem [resolvable:$true] %s282_s10 }
  0x6e   : > { %s3066_s19 = scalar_lea.hbm %s4002_s0, %s3970_s16  ;;  %s4004_s6 = sadd.s32 1, %s2782_s23 }
  0x6f   : > { %s3081_s16 = scalar_select %p179_p3, %s2782_s23, %s4004_s6  }
  0x70   : > { %s3084_s2 = scalar_select %p51_p6, %s2794_s26, %s53_s24  }
  0x71   : > { %s3086_s3 = scalar_lea.sflag [#allocation3], %s270_s14  ;;  %s2560_s29 = scalar_lea.hbm %s3066_s19, 512 }
  0x72   : > { %p2561_p8 = scmp.ne.s32.totalorder %s3066_s19, %s2560_s29  ;;  %p4005_p13 = scmp.ne.s32.totalorder %s3998_s21, 0 }
  0x73   : > { %s2565_s9 = scalar_lea.hbm %s4002_s0, 2048  ;;  %p2566_p12 = scmp.lt.u32.totalorder %s3066_s19, %s4002_s0 }
  0x74   : > { %p2562_p0 = pneg %p4005_p13  ;;  %p2567_p1 = scmp.lt.u32.totalorder %s2565_s9, %s2560_s29 }
  0x75   : > { %p2569_p2 = scmp.lt.u32.totalorder %s2560_s29, %s3066_s19 }
  0x76   : > { %p2563_p10 = pnand %p2562_p0, %p2561_p8  ;;  %p2568_p4 = por %p2567_p1, %p2566_p12 }
  0x78   : > { %p2564_p11 = pneg %p2563_p10  ;;  %p2570_p7 = por %p2569_p2, %p2568_p4 }
  0x7a   : > { %p2571_p9 = pnand %p2570_p7, %p2564_p11 }
  0x7c   : > { %2574 = shalt.err (!%p2571_p9)
}
  0x7d   : > { %s2575_s24 = scalar_lea.vmem %s3076_s10, 512  ;;  %s2820_s14 = smov [#allocation2]  }
  0x7e   : > { %p2576_p5 = scmp.ne.s32.totalorder %s3076_s10, %s2575_s24  ;;  %s2580_s6 = sshll.u32 %s2820_s14, 4  ;;  %s2581_s6 = int_to_ptr.vmem [resolvable:$false] %s2580_s6 }
  0x7f   : > { %s2582_s4 = scalar_lea.vmem %s2581_s6, 1024  ;;  %p2583_p8 = scmp.lt.s32.totalorder %s3076_s10, %s2581_s6 }
  0x80   : > { %p2578_p3 = pnand %p2576_p5, %p2562_p0  ;;  %p2584_p10 = scmp.lt.s32.totalorder %s2582_s4, %s2575_s24 }
  0x82   : > { %p2579_p6 = pneg %p2578_p3  ;;  %p2585_p12 = por %p2584_p10, %p2583_p8 }
  0x84   : > { %p2586_p1 = pnand %p2585_p12, %p2579_p6 }
  0x86   : > { %2589 = shalt.err (!%p2586_p1)
}
  0x87   : > { %s2821_s29 = smov 512   ;;  %s4006_s13 = smov 8  }
  0x88   : > { %s4007_s9 = smov 128   ;;  %s4008_s5 = sshll.u32 %s3051_s20, 7 }
  0x89   : > { %2024 = dma.hbm_to_vmem [thread:$0]  (!%p4005_p13), %s3066_s19, 512, %s3076_s10, %s3086_s3, %s2821_s29, %s4007_s9, %s4006_s13  }
  0x8a   : > { %s4009_s1 = sld [smem:[#allocation30_spill]]  ;;  %s296_s6 = scalar_lea.vmem [#allocation5], %s3059_s18 }
  0x8b   : > { %s304_s4 = sshll.u32 %s296_s6, 4  ;;  %s292_s0 = sand.u32 1, %s2814_s7   ;;  %s3126_s4 = int_to_ptr.vmem [resolvable:$true] %s304_s4 }
  0x8c   : > { %s3128_s12 = scalar_lea.sflag [#allocation6], %s292_s0 }
  0x90   : > { %s3122_s14 = scalar_lea.hbm %s4009_s1, %s4008_s5  ;;  %s2595_s19 = scalar_lea.hbm %s4009_s1, 2048 }
  0x91   : > { %s2590_s28 = scalar_lea.hbm %s3122_s14, 512  ;;  %p2596_p7 = scmp.lt.u32.totalorder %s3122_s14, %s4009_s1 }
  0x92   : > { %p2591_p11 = scmp.ne.s32.totalorder %s3122_s14, %s2590_s28  ;;  %p2597_p9 = scmp.lt.u32.totalorder %s2595_s19, %s2590_s28 }
  0x93   : > { %p2599_p3 = scmp.lt.u32.totalorder %s2590_s28, %s3122_s14 }
  0x94   : > { %p2593_p4 = pnand %p2591_p11, %p2562_p0  ;;  %p2598_p5 = por %p2597_p9, %p2596_p7 }
  0x96   : > { %p2594_p2 = pneg %p2593_p4  ;;  %p2600_p6 = por %p2599_p3, %p2598_p5 }
  0x98   : > { %p2601_p8 = pnand %p2600_p6, %p2594_p2 }
  0x9a   : > { %2604 = shalt.err (!%p2601_p8)
}
  0x9b   : > { %s2605_s0 = scalar_lea.vmem %s3126_s4, 512  ;;  %s2822_s18 = smov [#allocation5]  }
  0x9c   : > { %p2606_p10 = scmp.ne.s32.totalorder %s3126_s4, %s2605_s0  ;;  %s2610_s15 = sshll.u32 %s2822_s18, 4  ;;  %s2611_s15 = int_to_ptr.vmem [resolvable:$false] %s2610_s15 }
  0x9d   : > { %s2612_s24 = scalar_lea.vmem %s2611_s15, 1024  ;;  %p2613_p11 = scmp.lt.s32.totalorder %s3126_s4, %s2611_s15 }
  0x9e   : > { %p2608_p12 = pnand %p2606_p10, %p2562_p0  ;;  %p2614_p4 = scmp.lt.s32.totalorder %s2612_s24, %s2605_s0 }
  0xa0   : > { %p2609_p1 = pneg %p2608_p12  ;;  %p2615_p7 = por %p2614_p4, %p2613_p11 }
  0xa2   : > { %p2616_p9 = pnand %p2615_p7, %p2609_p1 }
  0xa4   : > { %2619 = shalt.err (!%p2616_p9)
}
  0xa5   : > { %2027 = dma.hbm_to_vmem [thread:$0]  (!%p4005_p13), %s3122_s14, 512, %s3126_s4, %s3128_s12, %s2821_s29, %s4007_s9, %s4006_s13  }
  0xa6   : > { %p4010_p0 = scmp.ne.s32.totalorder %s3995_s17, 0 }
  0xa7   : > { %s3160_s28 = sand.u32 (!%p4010_p0), 1, %s2790_s25   ;;  %p4011_p2 = scmp.ne.s32.totalorder (!%p4010_p0), %s3986_s11, 0 }
  0xa8   : > { %316 = sbr.rel (%p4010_p0) target bundleno = 1328 (0x530), region = 36  ;;  %s1967_s6 = sshll.u32 (!%p4010_p0), %s3160_s28, 5 }
  0xa9   : > { %s319_s3 = scalar_lea.sflag (!%p4010_p0), [#allocation3], %s3160_s28  ;;  %s3164_s20 = scalar_lea.vmem (!%p4010_p0), [#allocation2], %s1967_s6 }
  0xaf   : > { %2749 = dma.done.wait (%p4011_p2), %s319_s3, 512  }
  0xb0   : > { %2751 = vsyncadd (%p4011_p2), %s319_s3, 4294966784  ;;  %s327_s17 = sand.u32 1, %s2936_s8   ;;  %s3173_s12 = scalar_lea.vmem [#allocation5], %s1967_s6 }
  0xb1   : > { %s328_s21 = scalar_lea.sflag [#allocation6], %s327_s17 }
  0xb2   : > { %2753 = dma.done.wait (%p4011_p2), %s328_s21, 512  }
  0xb3   : > { %2755 = vsyncadd (%p4011_p2), %s328_s21, 4294966784  ;;  %p4012_p13 = scmp.eq.s32.totalorder %s2936_s8, 0 }
  0xb5   : > { %2757 = dma.done.wait (%p4012_p13), [#allocation6], 512   ;;  %p4013_p5 = pmov %p4012_p13 }
  0xb7   : > { %2759 = vsyncadd (%p4013_p5), [#allocation6], 4294966784  ;;  %p4014_p3 = pmov %p4013_p5 }
  0xb9   : > { %2761 = dma.done.wait (%p4014_p3), [#allocation9], 512   ;;  %p4015_p6 = pmov %p4014_p3 }
  0xba   : > { %s1971_s29 = sshll.u32 %s3160_s28, 4  ;;  %s373_s13 = sand.u32 1, %s2778_s22  }
  0xbb   : > { %2763 = vsyncadd (%p4015_p6), [#allocation9], 4294966784  ;;  %s1972_s9 = sshll.u32 %s373_s13, 4  ;;  %s3189_s14 = scalar_lea.vmem [#allocation10], %s1971_s29 }
  0xbc   : > { %s3191_s11 = scalar_lea.vmem [#allocation11], %s1972_s9  ;;  %s3193_s4 = scalar_lea.vmem [#allocation13], %s1972_s9 }
  0xbd   : > { %p1974_p8 = scmp.ne.s32.totalorder %s2798_s27, 0 }
  0xbe   : > { %vm393_vm0 = vcmask (!%p1974_p8), 7168   ;;  %v2823_v0 = vmov (!%p1974_p8), -inf   ;;  %v2824_v1 = vmov (!%p1974_p8), 0.0  }
  0xbf   : > { %392 = sbr.rel (%p1974_p8) target bundleno = 198 (0xc6), region = 56  ;;  %394 = vst.msk [vmem:[%s3191_s11] sm:$0xff] (!%p1974_p8), %vm393_vm0, %v2823_v0  ;;  %395 = vst.msk [vmem:[%s3191_s11 + $0x8] sm:$0xff] (!%p1974_p8), %vm393_vm0, %v2823_v0 }
  0xc0   : > { %396 = vst.msk [vmem:[%s3193_s4] sm:$0xff] (!%p1974_p8), %vm393_vm0, %v2824_v1  ;;  %397 = vst.msk [vmem:[%s3193_s4 + $0x8] sm:$0xff] (!%p1974_p8), %vm393_vm0, %v2824_v1 }
  0xc6 PF: > { %v3200_v2 = vld [vmem:[#allocation8 + $0x10] sm:$0xff]  ;;  %v3202_v3 = vld [vmem:[#allocation8] sm:$0xff]  ;;  %v2825_v4 = vmov 0   ;;  %v3208_v5 = vld [vmem:[#allocation8 + $0x18] sm:$0xff]  ;;  %v2826_v11 = vmov 1   ;;  %v2827_v12 = vmov 2  }
  0xc7   : > { %2159 = vset.pattern.permute.xlu1 %v2825_v4  ;;  %2158 = vset.pattern.permute.xlu0 %v2825_v4  ;;  %v3210_v6 = vld [vmem:[#allocation8 + $0x8] sm:$0xff]  ;;  %v3216_v8 = vld [vmem:[#allocation7] sm:$0xff]  ;;  %v3220_v9 = vld [vmem:[#allocation7 + $0x18] sm:$0xff]  ;;  %v2828_v13 = vmov 3   ;;  %v2829_v14 = vmov 4   ;;  %v2830_v15 = vmov 5  }
  0xc8   : > { %450 = vperm.xlu1 %2159, %v3200_v2   ;;  %440 = vperm.xlu0 %2158, %v3202_v3   ;;  %v3214_v7 = vld [vmem:[#allocation7 + $0x8] sm:$0xff]  ;;  %v3222_v10 = vld [vmem:[#allocation7 + $0x10] sm:$0xff]  ;;  %v2831_v16 = vmov 6   ;;  %v410_v18 = vld [vmem:[%s3173_s12] sm:$0xff]  ;;  %v2832_v19 = vmov 7   ;;  %vm1038_vm1 = vcmask 1040384  }
  0xc9   : > { %v412_v17 = vld [vmem:[%s3173_s12 + $0x10] sm:$0xff]  ;;  %v1979_v21 = vclamps-f32 %v410_v18, 2.3025851  ;;  %v413_v22 = vld [vmem:[%s3173_s12 + $0x18] sm:$0xff]  ;;  %v411_v23 = vld [vmem:[%s3173_s12 + $0x8] sm:$0xff]  ;;  %vm1040_vm2 = vcmask 1041408  }
  0xca   : > { %v1981_v20 = vclamps-f32 %v412_v17, 2.3025851  ;;  %v1982_v25 = vclamps-f32 %v413_v22, 2.3025851  ;;  %v1980_v27 = vclamps-f32 %v411_v23, 2.3025851 }
  0xcb   : > { %v422_v26 = vmul.f32 1.442695, %v1979_v21  ;;  %v398_v38 = vld [vmem:[%s3164_s20] sm:$0xff]  ;;  %v400_v44 = vld [vmem:[%s3164_s20 + $0x10] sm:$0xff]  ;;  %v399_v46 = vld [vmem:[%s3164_s20 + $0x8] sm:$0xff]  ;;  %vm1042_vm3 = vcmask 1042432  }
  0xcc   : > { %455 = vperm.xlu1 %2159, %v3208_v5   ;;  %445 = vperm.xlu0 %2158, %v3210_v6   ;;  %v426_v24 = vmul.f32 1.442695, %v1981_v20  ;;  %v428_v28 = vmul.f32 1.442695, %v1982_v25  ;;  %v424_v29 = vmul.f32 1.442695, %v1980_v27 }
  0xcd   : > { %v3296_v43 = vclamps-f32 %v398_v38, 1.4142135  ;;  %v401_v48 = vld [vmem:[%s3164_s20 + $0x18] sm:$0xff]  ;;  %v3303_v50 = vclamps-f32 %v400_v44, 1.4142135  ;;  %vm1044_vm4 = vcmask 1043456  }
  0xce   : > { %2224 = vpow2.f32 %v426_v24  ;;  %v3305_v51 = vclamps-f32 %v399_v46, 1.4142135  ;;  %v3307_v52 = vclamps-f32 %v401_v48, 1.4142135  ;;  %vm1046_vm5 = vcmask 1044480   ;;  %s4016_s19 = sld [smem:[#allocation21_spill]] }
  0xcf   : > { %2226 = vpow2.f32 %v422_v26  ;;  %vm1048_vm6 = vcmask 1045504   ;;  %vm1050_vm7 = vcmask 1046528   ;;  %vm1073_vm8 = vcmask 7168   ;;  %s4017_s10 = sld [smem:[#allocation25_spill]]  ;;  %s4018_s24 = sld [smem:[#allocation34_spill]] }
  0xd0   : > { %469 = vperm.xlu1 %2159, %v3214_v7   ;;  %464 = vperm.xlu0 %2158, %v3216_v8   ;;  %2228 = vpow2.f32 %v428_v28  ;;  %s1739_s20 = sshll.u32 %s3191_s11, 4  ;;  %s3795_s21 = scalar_lea.sflag [#allocation12], %s327_s17  ;;  %s3791_s20 = int_to_ptr.vmem [resolvable:$true] %s1739_s20 }
  0xd1   : > { %2230 = vpow2.f32 %v424_v29  ;;  %s2620_s12 = scalar_lea.vmem %s3791_s20, 256  ;;  %s2841_s29 = smov [#allocation11]  }
  0xd2   : > { %p2621_p10 = scmp.ne.s32.totalorder %s3791_s20, %s2620_s12  ;;  %s2624_s13 = sshll.u32 %s2841_s29, 4  ;;  %s2625_s13 = int_to_ptr.vmem [resolvable:$false] %s2624_s13 }
  0xd3   : > { %s2626_s9 = scalar_lea.vmem %s2625_s13, 512  ;;  %p2627_p4 = scmp.lt.s32.totalorder %s3791_s20, %s2625_s13 }
  0xd4   : > { %479 = vperm.xlu1 %2159, %v3220_v9   ;;  %474 = vperm.xlu0 %2158, %v3222_v10   ;;  %s1986_s5 = sshll.u32 %s4016_s19, 1  ;;  %s3974_s0 = sshll.u32 %s4016_s19, 8 }
  0xd5   : > { %s4019_s6 = smov %s4018_s24  ;;  %s3788_s3 = scalar_lea.hbm %s4018_s24, %s3974_s0 }
  0xd6   : > { %p4020_p12 = scmp.ne.s32.totalorder %s4017_s10, 0  ;;  %p2628_p7 = scmp.lt.s32.totalorder %s2626_s9, %s2620_s12 }
  0xd8   : > { %2161 = vset.pattern.permute.xlu1 %v2826_v11  ;;  %2160 = vset.pattern.permute.xlu0 %v2826_v11  ;;  %v3281_v30 = vpop.eup %2224  ;;  %p2622_p1 = pnand %p2621_p10, %p4020_p12  ;;  %p2629_p9 = por %p2628_p7, %p2627_p4 }
  0xd9   : > { %525 = vperm.xlu1 %2161, %v3210_v6   ;;  %521 = vperm.xlu0 %2160, %v3202_v3   ;;  %v3283_v31 = vpop.eup %2226 }
  0xda   : > { %v3286_v34 = vpop.eup %2228  ;;  %p2623_p11 = pneg %p2622_p1 }
  0xdb   : > { %v3290_v37 = vpop.eup %2230 }
  0xdc   : > { %p2630_p0 = pnand %p2629_p9, %p2623_p11 }
  0xdd   : > { %529 = vperm.xlu1 %2161, %v3200_v2   ;;  %533 = vperm.xlu0 %2160, %v3208_v5  }
  0xe1   : > { %541 = vperm.xlu1 %2161, %v3216_v8   ;;  %545 = vperm.xlu0 %2160, %v3214_v7  }
  0xe5   : > { %549 = vperm.xlu1 %2161, %v3222_v10   ;;  %553 = vperm.xlu0 %2160, %v3220_v9  }
  0xe9   : > { %2162 = vset.pattern.permute.xlu1 %v2827_v12  ;;  %2163 = vset.pattern.permute.xlu0 %v2827_v12 }
  0xea   : > { %595 = vperm.xlu1 %2162, %v3202_v3   ;;  %599 = vperm.xlu0 %2163, %v3210_v6  }
  0xee   : > { %603 = vperm.xlu1 %2162, %v3200_v2   ;;  %615 = vperm.xlu0 %2163, %v3216_v8  }
  0xf2   : > { %607 = vperm.xlu1 %2162, %v3208_v5   ;;  %623 = vperm.xlu0 %2163, %v3222_v10  }
  0xf6   : > { %619 = vperm.xlu1 %2162, %v3214_v7   ;;  %2164 = vset.pattern.permute.xlu0 %v2828_v13 }
  0xf7   : > { %669 = vperm.xlu0 %2164, %v3202_v3  }
  0xfa   : > { %627 = vperm.xlu1 %2162, %v3220_v9  }
  0xfb   : > { %681 = vperm.xlu0 %2164, %v3208_v5  }
  0xfe   : > { %2165 = vset.pattern.permute.xlu1 %v2828_v13 }
  0xff   : > { %673 = vperm.xlu1 %2165, %v3210_v6   ;;  %693 = vperm.xlu0 %2164, %v3214_v7  }
 0x103   : > { %677 = vperm.xlu1 %2165, %v3200_v2   ;;  %701 = vperm.xlu0 %2164, %v3220_v9  }
 0x107   : > { %689 = vperm.xlu1 %2165, %v3216_v8   ;;  %2167 = vset.pattern.permute.xlu0 %v2829_v14 }
 0x108   : > { %747 = vperm.xlu0 %2167, %v3210_v6  }
 0x10b   : > { %697 = vperm.xlu1 %2165, %v3222_v10  }
 0x10c   : > { %763 = vperm.xlu0 %2167, %v3216_v8  }
 0x10f   : > { %2166 = vset.pattern.permute.xlu1 %v2829_v14 }
 0x110   : > { %743 = vperm.xlu1 %2166, %v3202_v3   ;;  %771 = vperm.xlu0 %2167, %v3222_v10  }
 0x114   : > { %751 = vperm.xlu1 %2166, %v3200_v2   ;;  %2168 = vset.pattern.permute.xlu0 %v2830_v15 }
 0x115   : > { %817 = vperm.xlu0 %2168, %v3202_v3  }
 0x118   : > { %755 = vperm.xlu1 %2166, %v3208_v5  }
 0x119   : > { %829 = vperm.xlu0 %2168, %v3208_v5  }
 0x11c   : > { %767 = vperm.xlu1 %2166, %v3214_v7  }
 0x11d   : > { %841 = vperm.xlu0 %2168, %v3214_v7  }
 0x120   : > { %775 = vperm.xlu1 %2166, %v3220_v9  }
 0x121   : > { %849 = vperm.xlu0 %2168, %v3220_v9  }
 0x124   : > { %2169 = vset.pattern.permute.xlu1 %v2830_v15 }
 0x125   : > { %821 = vperm.xlu1 %2169, %v3210_v6   ;;  %2171 = vset.pattern.permute.xlu0 %v2831_v16 }
 0x126   : > { %895 = vperm.xlu0 %2171, %v3210_v6  }
 0x129   : > { %825 = vperm.xlu1 %2169, %v3200_v2  }
 0x12a   : > { %911 = vperm.xlu0 %2171, %v3216_v8  }
 0x12d   : > { %837 = vperm.xlu1 %2169, %v3216_v8  }
 0x12e   : > { %919 = vperm.xlu0 %2171, %v3222_v10  }
 0x131   : > { %845 = vperm.xlu1 %2169, %v3222_v10  }
 0x132   : > { %2172 = vset.pattern.permute.xlu0 %v2832_v19 }
 0x133   : > { %965 = vperm.xlu0 %2172, %v3202_v3  }
 0x135   : > { %2170 = vset.pattern.permute.xlu1 %v2831_v16 }
 0x136   : > { %891 = vperm.xlu1 %2170, %v3202_v3  }
 0x137   : > { %977 = vperm.xlu0 %2172, %v3208_v5  }
 0x13a   : > { %899 = vperm.xlu1 %2170, %v3200_v2  }
 0x13b   : > { %989 = vperm.xlu0 %2172, %v3214_v7  }
 0x13e   : > { %903 = vperm.xlu1 %2170, %v3208_v5  }
 0x13f   : > { %997 = vperm.xlu0 %2172, %v3220_v9  }
 0x142   : > { %915 = vperm.xlu1 %2170, %v3214_v7  }
 0x146   : > { %923 = vperm.xlu1 %2170, %v3220_v9  }
 0x147   : > { %v451_v32 = vpop.permute.xlu1 %450  ;;  %v441_v33 = vpop.permute.xlu0 %440 }
 0x148   : > { %v460_v35 = vadd.f32 %v3281_v30, %v451_v32  ;;  %v458_v36 = vadd.f32 %v3283_v31, %v441_v33 }
 0x14a   : > { %2232 = vlog2.f32 %v460_v35  ;;  %2173 = vset.pattern.permute.xlu1 %v2832_v19 }
 0x14b   : > { %2234 = vrcp.f32 %v460_v35  ;;  %v456_v39 = vpop.permute.xlu1 %455  ;;  %v446_v40 = vpop.permute.xlu0 %445  ;;  %969 = vperm.xlu1 %2173, %v3210_v6  }
 0x14c   : > { %2236 = vlog2.f32 %v458_v36  ;;  %v461_v41 = vadd.f32 %v3286_v34, %v456_v39  ;;  %v459_v42 = vadd.f32 %v3290_v37, %v446_v40 }
 0x14d   : > { %2238 = vrcp.f32 %v458_v36 }
 0x14e   : > { %2240 = vlog2.f32 %v461_v41 }
 0x14f   : > { %2242 = vrcp.f32 %v461_v41  ;;  %v470_v45 = vpop.permute.xlu1 %469  ;;  %973 = vperm.xlu1 %2173, %v3200_v2   ;;  %v465_v47 = vpop.permute.xlu0 %464 }
 0x150   : > { %2244 = vlog2.f32 %v459_v42  ;;  %v482_v49 = vsub.f32 %v3296_v43, %v465_v47  ;;  %v483_v60 = vsub.f32 %v3305_v51, %v470_v45 }
 0x151   : > { %2246 = vrcp.f32 %v459_v42 }
 0x152   : > { %v494_v56 = vmul.f32 %v482_v49, %v482_v49  ;;  %v495_v18 = vmul.f32 %v483_v60, %v483_v60 }
 0x153   : > { %v480_v53 = vpop.permute.xlu1 %479  ;;  %985 = vperm.xlu1 %2173, %v3216_v8   ;;  %v475_v54 = vpop.permute.xlu0 %474 }
 0x154   : > { %v2233_v55 = vpop.eup %2232  ;;  %v484_v57 = vsub.f32 %v3303_v50, %v475_v54  ;;  %v485_v61 = vsub.f32 %v3307_v52, %v480_v53 }
 0x155   : > { %v2235_v58 = vpop.eup %2234  ;;  %v491_v27 = vmul.f32 0.6931472, %v2233_v55 }
 0x156   : > { %v2237_v59 = vpop.eup %2236  ;;  %v496_v11 = vmul.f32 %v484_v57, %v484_v57  ;;  %v497_v19 = vmul.f32 %v485_v61, %v485_v61 }
 0x157   : > { %v2239_v62 = vpop.eup %2238  ;;  %993 = vperm.xlu1 %2173, %v3222_v10   ;;  %v487_v0 = vmul.f32 0.6931472, %v2237_v59  ;;  %v2833_v59 = vmov 14  }
 0x158   : > { %v2241_v63 = vpop.eup %2240  ;;  %v499_v1 = vmul.f32 %v2239_v62, %v494_v56  ;;  %v526_v12 = vpop.permute.xlu1 %525  ;;  %v503_v24 = vmul.f32 %v2235_v58, %v496_v11  ;;  %2187 = vset.pattern.permute.xlu0 %v2833_v59 }
 0x159   : > { %v522_v13 = vpop.permute.xlu0 %521  ;;  %v2243_v14 = vpop.eup %2242  ;;  %v537_v15 = vadd.f32 %v3290_v37, %v526_v12  ;;  %v493_v32 = vmul.f32 0.6931472, %v2241_v63  ;;  %1521 = vperm.xlu0 %2187, %v3202_v3  }
 0x15a   : > { %v536_v16 = vadd.f32 %v3283_v31, %v522_v13  ;;  %v2245_v17 = vpop.eup %2244  ;;  %v506_v23 = vadd.f32 %v499_v1, %v487_v0  ;;  %v505_v35 = vmul.f32 %v2243_v14, %v497_v19  ;;  %v508_v38 = vadd.f32 %v503_v24, %v491_v27 }
 0x15b   : > { %v2247_v20 = vpop.eup %2246  ;;  %v489_v21 = vmul.f32 0.6931472, %v2245_v17  ;;  %2248 = vlog2.f32 %v537_v15 }
 0x15c   : > { %v501_v22 = vmul.f32 %v2247_v20, %v495_v18  ;;  %2250 = vrcp.f32 %v537_v15  ;;  %v530_v25 = vpop.permute.xlu1 %529  ;;  %v509_v44 = vadd.f32 %v505_v35, %v493_v32 }
 0x15d   : > { %v534_v26 = vpop.permute.xlu0 %533  ;;  %2252 = vlog2.f32 %v536_v16  ;;  %v538_v28 = vadd.f32 %v3281_v30, %v530_v25  ;;  %v2834_v25 = vmov 13  }
 0x15e   : > { %v539_v29 = vadd.f32 %v3286_v34, %v534_v26  ;;  %v507_v33 = vadd.f32 %v501_v22, %v489_v21  ;;  %2254 = vrcp.f32 %v536_v16  ;;  %2188 = vset.pattern.permute.xlu0 %v2834_v25 }
 0x15f   : > { %2256 = vlog2.f32 %v538_v28  ;;  %1451 = vperm.xlu0 %2188, %v3210_v6  }
 0x160   : > { %v510_v36 = vadd.f32 %v507_v33, %v506_v23  ;;  %2258 = vrcp.f32 %v538_v28  ;;  %v542_v39 = vpop.permute.xlu1 %541 }
 0x161   : > { %v546_v40 = vpop.permute.xlu0 %545  ;;  %2260 = vlog2.f32 %v539_v29  ;;  %v556_v41 = vsub.f32 %v3296_v43, %v542_v39 }
 0x162   : > { %v557_v42 = vsub.f32 %v3305_v51, %v546_v40  ;;  %v511_v45 = vadd.f32 %v510_v36, %v508_v38  ;;  %2262 = vrcp.f32 %v539_v29 }
 0x163   : > { %v568_v54 = vmul.f32 %v556_v41, %v556_v41  ;;  %1455 = vperm.xlu0 %2188, %v3200_v2   ;;  %v2836_v2 = vmov 8  }
 0x164   : > { %v569_v46 = vmul.f32 %v557_v42, %v557_v42  ;;  %v512_v47 = vadd.f32 %v511_v45, %v509_v44  ;;  %v550_v48 = vpop.permute.xlu1 %549  ;;  %2174 = vset.pattern.permute.xlu1 %v2836_v2 }
 0x165   : > { %v554_v49 = vpop.permute.xlu0 %553  ;;  %v2249_v53 = vpop.eup %2248  ;;  %v558_v55 = vsub.f32 %v3303_v50, %v550_v48 }
 0x166   : > { %v559_v56 = vsub.f32 %v3307_v52, %v554_v49  ;;  %v2251_v57 = vpop.eup %2250  ;;  %v563_v58 = vmul.f32 0.6931472, %v2249_v53  ;;  %v513_v61 = vrot.slane %v512_v47, 4 }
 0x167   : > { %v2253_v60 = vpop.eup %2252  ;;  %v575_v62 = vmul.f32 %v2251_v57, %v569_v46  ;;  %v570_v63 = vmul.f32 %v558_v55, %v558_v55 }
 0x168   : > { %v2255_v0 = vpop.eup %2254  ;;  %v561_v1 = vmul.f32 0.6931472, %v2253_v60  ;;  %v571_v14 = vmul.f32 %v559_v56, %v559_v56  ;;  %v514_v22 = vadd.f32 %v513_v61, %v512_v47 }
 0x169   : > { %v2257_v11 = vpop.eup %2256  ;;  %v573_v12 = vmul.f32 %v2255_v0, %v568_v54  ;;  %v581_v13 = vadd.f32 %v575_v62, %v563_v58  ;;  %v596_v15 = vpop.permute.xlu1 %595  ;;  %v2835_v54 = vmov 9  }
 0x16a   : > { %v600_v16 = vpop.permute.xlu0 %599  ;;  %v2259_v17 = vpop.eup %2258  ;;  %v565_v18 = vmul.f32 0.6931472, %v2257_v11  ;;  %v610_v19 = vadd.f32 %v3283_v31, %v596_v15  ;;  %v515_v38 = vrot.slane %v514_v22, 2  ;;  %2191 = vset.pattern.permute.xlu0 %v2835_v54 }
 0x16b   : > { %v611_v20 = vadd.f32 %v3290_v37, %v600_v16  ;;  %v2261_v21 = vpop.eup %2260  ;;  %v580_v23 = vadd.f32 %v573_v12, %v561_v1  ;;  %v577_v24 = vmul.f32 %v2259_v17, %v570_v63  ;;  %1163 = vperm.xlu0 %2191, %v3208_v5  }
 0x16c   : > { %v2263_v26 = vpop.eup %2262  ;;  %v567_v27 = vmul.f32 0.6931472, %v2261_v21  ;;  %2264 = vlog2.f32 %v610_v19  ;;  %v516_v47 = vadd.f32 %v515_v38, %v514_v22 }
 0x16d   : > { %v584_v28 = vadd.f32 %v581_v13, %v580_v23  ;;  %v582_v29 = vadd.f32 %v577_v24, %v565_v18  ;;  %v579_v32 = vmul.f32 %v2263_v26, %v571_v14  ;;  %2266 = vrcp.f32 %v610_v19  ;;  %v604_v33 = vpop.permute.xlu1 %603 }
 0x16e   : > { %v616_v35 = vpop.permute.xlu0 %615  ;;  %2268 = vlog2.f32 %v611_v20  ;;  %v612_v36 = vadd.f32 %v3281_v30, %v604_v33  ;;  %v517_v62 = vrot.slane %v516_v47, 1 }
 0x16f   : > { %v585_v39 = vadd.f32 %v584_v28, %v582_v29  ;;  %v583_v40 = vadd.f32 %v579_v32, %v567_v27  ;;  %2270 = vrcp.f32 %v611_v20  ;;  %v630_v41 = vsub.f32 %v3296_v43, %v616_v35  ;;  %1171 = vperm.xlu0 %2191, %v3216_v8  }
 0x170   : > { %2272 = vlog2.f32 %v612_v36  ;;  %v518_v23 = vadd.f32 %v517_v62, %v516_v47 }
 0x171   : > { %v586_v42 = vadd.f32 %v585_v39, %v583_v40  ;;  %2274 = vrcp.f32 %v612_v36  ;;  %v608_v44 = vpop.permute.xlu1 %607  ;;  %v642_v49 = vmul.f32 %v630_v41, %v630_v41 }
 0x172   : > { %v624_v45 = vpop.permute.xlu0 %623  ;;  %v613_v46 = vadd.f32 %v3286_v34, %v608_v44 }
 0x173   : > { %v587_v48 = vrot.slane %v586_v42, 4  ;;  %v632_v53 = vsub.f32 %v3303_v50, %v624_v45  ;;  %2196 = vset.pattern.permute.xlu0 %v2836_v2 }
 0x174   : > { %2276 = vlog2.f32 %v613_v46  ;;  %1081 = vperm.xlu0 %2196, %v3210_v6  }
 0x175   : > { %v588_v55 = vadd.f32 %v587_v48, %v586_v42  ;;  %2278 = vrcp.f32 %v613_v46  ;;  %v620_v56 = vpop.permute.xlu1 %619  ;;  %v644_v13 = vmul.f32 %v632_v53, %v632_v53  ;;  %v519_v42 = vmul.f32 -0.5, %v518_v23 }
 0x176   : > { %v2265_v57 = vpop.eup %2264  ;;  %v631_v58 = vsub.f32 %v3305_v51, %v620_v56  ;;  %v3337_v60 = vpop.permute.xlu0 %669 }
 0x177   : > { %v2267_v61 = vpop.eup %2266  ;;  %v589_v63 = vrot.slane %v588_v55, 2  ;;  %v635_v1 = vmul.f32 0.6931472, %v2265_v57 }
 0x178   : > { %v2269_v0 = vpop.eup %2268  ;;  %v647_v11 = vmul.f32 %v2267_v61, %v642_v49  ;;  %v643_v12 = vmul.f32 %v631_v58, %v631_v58  ;;  %1105 = vperm.xlu0 %2196, %v3222_v10   ;;  %v2837_v61 = vmov 12  }
 0x179   : > { %v2271_v14 = vpop.eup %2270  ;;  %v590_v15 = vadd.f32 %v589_v63, %v588_v55  ;;  %v637_v16 = vmul.f32 0.6931472, %v2269_v0  ;;  %v628_v17 = vpop.permute.xlu1 %627 }
 0x17a   : > { %v2273_v18 = vpop.eup %2272  ;;  %v649_v19 = vmul.f32 %v2271_v14, %v643_v12  ;;  %v633_v20 = vsub.f32 %v3307_v52, %v628_v17  ;;  %v3341_v21 = vpop.permute.xlu0 %681  ;;  %v654_v27 = vadd.f32 %v647_v11, %v635_v1 }
 0x17b   : > { %v2275_v22 = vpop.eup %2274  ;;  %v591_v24 = vrot.slane %v590_v15, 1  ;;  %v639_v26 = vmul.f32 0.6931472, %v2273_v18 }
 0x17c   : > { %v655_v28 = vadd.f32 %v649_v19, %v637_v16  ;;  %v651_v29 = vmul.f32 %v2275_v22, %v644_v13  ;;  %v645_v32 = vmul.f32 %v633_v20, %v633_v20  ;;  %2201 = vset.pattern.permute.xlu0 %v2837_v61  ;;  %v684_v22 = vadd.f32 %v3283_v31, %v3337_v60 }
 0x17d   : > { %v592_v33 = vadd.f32 %v591_v24, %v590_v15  ;;  %1373 = vperm.xlu0 %2201, %v3202_v3   ;;  %v2838_v3 = vmov 11   ;;  %v2839_v24 = vmov 10  }
 0x17e   : > { %v2277_v35 = vpop.eup %2276  ;;  %v658_v36 = vadd.f32 %v655_v28, %v654_v27  ;;  %v656_v38 = vadd.f32 %v651_v29, %v639_v26  ;;  %v674_v39 = vpop.permute.xlu1 %673  ;;  %v687_v26 = vadd.f32 %v3286_v34, %v3341_v21  ;;  %2280 = vlog2.f32 %v684_v22 }
 0x17f   : > { %v3344_v40 = vpop.permute.xlu0 %693  ;;  %v2279_v41 = vpop.eup %2278  ;;  %v593_v44 = vmul.f32 -0.5, %v592_v33  ;;  %v641_v45 = vmul.f32 0.6931472, %v2277_v35  ;;  %2282 = vrcp.f32 %v684_v22 }
 0x180   : > { %v659_v46 = vadd.f32 %v658_v36, %v656_v38  ;;  %v653_v47 = vmul.f32 %v2279_v41, %v645_v32  ;;  %2284 = vlog2.f32 %v687_v26 }
 0x181   : > { %v1039_v48 = vsel %vm1038_vm1, %v519_v42, %v593_v44  ;;  %1385 = vperm.xlu0 %2201, %v3208_v5   ;;  %2286 = vrcp.f32 %v687_v26 }
 0x182   : > { %v657_v49 = vadd.f32 %v653_v47, %v641_v45  ;;  %v678_v53 = vpop.permute.xlu1 %677  ;;  %v705_v45 = vsub.f32 %v3305_v51, %v3344_v40 }
 0x183   : > { %v3348_v55 = vpop.permute.xlu0 %701 }
 0x184   : > { %v660_v56 = vadd.f32 %v659_v46, %v657_v49  ;;  %v717_v40 = vmul.f32 %v705_v45, %v705_v45 }
 0x185   : > { %1397 = vperm.xlu0 %2201, %v3214_v7  }
 0x186   : > { %v661_v57 = vrot.slane %v660_v56, 4  ;;  %v690_v58 = vpop.permute.xlu1 %689 }
 0x187   : > { %v748_v6 = vpop.permute.xlu0 %747 }
 0x188   : > { %v662_v62 = vadd.f32 %v661_v57, %v660_v56  ;;  %v2281_v33 = vpop.eup %2280  ;;  %v707_v57 = vsub.f32 %v3307_v52, %v3348_v55 }
 0x189   : > { %2206 = vset.pattern.permute.xlu0 %v2838_v3  ;;  %v2283_v36 = vpop.eup %2282 }
 0x18a   : > { %v663_v63 = vrot.slane %v662_v62, 2  ;;  %v3353_v0 = vpop.permute.xlu1 %697  ;;  %1323 = vperm.xlu0 %2206, %v3214_v7   ;;  %v685_v7 = vadd.f32 %v3290_v37, %v674_v39  ;;  %v2285_v38 = vpop.eup %2284  ;;  %v704_v39 = vsub.f32 %v3296_v43, %v690_v58 }
 0x18b   : > { %v3355_v1 = vpop.permute.xlu0 %763  ;;  %v2287_v44 = vpop.eup %2286 }
 0x18c   : > { %v664_v11 = vadd.f32 %v663_v63, %v662_v62  ;;  %2288 = vlog2.f32 %v685_v7  ;;  %v716_v56 = vmul.f32 %v704_v39, %v704_v39 }
 0x18d   : > { %2290 = vrcp.f32 %v685_v7 }
 0x18e   : > { %v665_v12 = vrot.slane %v664_v11, 1  ;;  %1327 = vperm.xlu0 %2206, %v3222_v10   ;;  %v686_v10 = vadd.f32 %v3281_v30, %v678_v53 }
 0x18f   : > { %v744_v13 = vpop.permute.xlu1 %743  ;;  %v3359_v15 = vpop.permute.xlu0 %771 }
 0x190   : > { %v666_v14 = vadd.f32 %v665_v12, %v664_v11  ;;  %2292 = vlog2.f32 %v686_v10  ;;  %v758_v21 = vadd.f32 %v3283_v31, %v744_v13  ;;  %v706_v11 = vsub.f32 %v3303_v50, %v3353_v0 }
 0x191   : > { %2294 = vrcp.f32 %v686_v10 }
 0x192   : > { %v667_v16 = vmul.f32 -0.5, %v666_v14  ;;  %2209 = vset.pattern.permute.xlu0 %v2839_v24  ;;  %v709_v14 = vmul.f32 0.6931472, %v2281_v33 }
 0x193   : > { %v752_v17 = vpop.permute.xlu1 %751  ;;  %1245 = vperm.xlu0 %2209, %v3216_v8   ;;  %v759_v8 = vadd.f32 %v3290_v37, %v748_v6 }
 0x194   : > { %v3363_v18 = vsel %vm1040_vm2, %v1039_v48, %v667_v16  ;;  %v818_v5 = vpop.permute.xlu0 %817  ;;  %v760_v29 = vadd.f32 %v3281_v30, %v752_v17  ;;  %v721_v17 = vmul.f32 %v2283_v36, %v716_v56 }
 0x195   : > { %2296 = vlog2.f32 %v759_v8  ;;  %v832_v35 = vadd.f32 %v3283_v31, %v818_v5  ;;  %v719_v5 = vmul.f32 %v707_v57, %v707_v57 }
 0x196   : > { %2298 = vrcp.f32 %v759_v8  ;;  %v2289_v46 = vpop.eup %2288 }
 0x197   : > { %v756_v19 = vpop.permute.xlu1 %755  ;;  %1257 = vperm.xlu0 %2209, %v3220_v9   ;;  %2300 = vlog2.f32 %v758_v21  ;;  %v2291_v49 = vpop.eup %2290  ;;  %v711_v7 = vmul.f32 0.6931472, %v2289_v46  ;;  %v727_v36 = vmul.f32 %v2287_v44, %v719_v5 }
 0x198   : > { %v3369_v23 = vpop.permute.xlu0 %829  ;;  %2302 = vrcp.f32 %v758_v21  ;;  %v761_v41 = vadd.f32 %v3286_v34, %v756_v19  ;;  %v778_v19 = vsub.f32 %v3296_v43, %v3355_v1  ;;  %v723_v10 = vmul.f32 %v2291_v49, %v717_v40 }
 0x199   : > { %2304 = vlog2.f32 %v760_v29  ;;  %v835_v21 = vadd.f32 %v3286_v34, %v3369_v23 }
 0x19a   : > { %2306 = vrcp.f32 %v760_v29  ;;  %v2293_v53 = vpop.eup %2292  ;;  %v790_v39 = vmul.f32 %v778_v19, %v778_v19  ;;  %v729_v46 = vadd.f32 %v723_v10, %v711_v7 }
 0x19b   : > { %v768_v20 = vpop.permute.xlu1 %767  ;;  %2308 = vlog2.f32 %v832_v35  ;;  %v2295_v62 = vpop.eup %2294  ;;  %v713_v45 = vmul.f32 0.6931472, %v2293_v53 }
 0x19c   : > { %v3380_v60 = vpop.permute.xlu0 %841  ;;  %2310 = vrcp.f32 %v832_v35  ;;  %v779_v16 = vsub.f32 %v3305_v51, %v768_v20  ;;  %v728_v35 = vadd.f32 %v721_v17, %v709_v14 }
 0x19d   : > { %2312 = vlog2.f32 %v761_v41  ;;  %v853_v53 = vsub.f32 %v3305_v51, %v3380_v60 }
 0x19e   : > { %2314 = vrcp.f32 %v761_v41  ;;  %v791_v33 = vmul.f32 %v779_v16, %v779_v16  ;;  %v732_v5 = vadd.f32 %v729_v46, %v728_v35 }
 0x19f   : > { %v3375_v27 = vpop.permute.xlu1 %775  ;;  %v2297_v63 = vpop.eup %2296  ;;  %v865_v10 = vmul.f32 %v853_v53, %v853_v53 }
 0x1a0   : > { %v3385_v9 = vpop.permute.xlu0 %849  ;;  %v2299_v13 = vpop.eup %2298  ;;  %v785_v56 = vmul.f32 0.6931472, %v2297_v63  ;;  %v781_v16 = vsub.f32 %v3307_v52, %v3375_v27 }
 0x1a1   : > { %v2301_v55 = vpop.eup %2300  ;;  %v797_v44 = vmul.f32 %v2299_v13, %v791_v33 }
 0x1a2   : > { %v2303_v26 = vpop.eup %2302 }
 0x1a3   : > { %v2305_v8 = vpop.eup %2304  ;;  %v803_v7 = vadd.f32 %v797_v44, %v785_v56 }
 0x1a4   : > { %v822_v28 = vpop.permute.xlu1 %821  ;;  %v2307_v29 = vpop.eup %2306 }
 0x1a5   : > { %v833_v47 = vadd.f32 %v3290_v37, %v822_v28  ;;  %v896_v48 = vpop.permute.xlu0 %895  ;;  %v718_v28 = vmul.f32 %v706_v11, %v706_v11  ;;  %v2309_v1 = vpop.eup %2308  ;;  %v783_v11 = vmul.f32 0.6931472, %v2301_v55 }
 0x1a6   : > { %v907_v6 = vadd.f32 %v3290_v37, %v896_v48  ;;  %v2311_v41 = vpop.eup %2310  ;;  %v857_v46 = vmul.f32 0.6931472, %v2309_v1 }
 0x1a7   : > { %2316 = vlog2.f32 %v833_v47  ;;  %v3411_v48 = vpop.eup %2312  ;;  %v725_v49 = vmul.f32 %v2295_v62, %v718_v28  ;;  %v787_v28 = vmul.f32 0.6931472, %v2305_v8 }
 0x1a8   : > { %v826_v32 = vpop.permute.xlu1 %825  ;;  %2318 = vrcp.f32 %v833_v47  ;;  %v780_v47 = vsub.f32 %v3303_v50, %v3359_v15 }
 0x1a9   : > { %v834_v12 = vadd.f32 %v3281_v30, %v826_v32  ;;  %2320 = vlog2.f32 %v907_v6  ;;  %v912_v22 = vpop.permute.xlu0 %911  ;;  %v715_v32 = vmul.f32 0.6931472, %v2285_v38 }
 0x1aa   : > { %2322 = vrcp.f32 %v907_v6  ;;  %v3414_v6 = vpop.eup %2314  ;;  %v926_v62 = vsub.f32 %v3296_v43, %v912_v22  ;;  %v792_v14 = vmul.f32 %v780_v47, %v780_v47 }
 0x1ab   : > { %2324 = vlog2.f32 %v834_v12  ;;  %v3425_v19 = vadd.f32 %v727_v36, %v715_v32  ;;  %v793_v32 = vmul.f32 %v781_v16, %v781_v16 }
 0x1ac   : > { %v3390_v42 = vpop.permute.xlu1 %837  ;;  %2326 = vrcp.f32 %v834_v12  ;;  %v795_v12 = vmul.f32 %v2303_v26, %v790_v39  ;;  %v730_v26 = vadd.f32 %v725_v49, %v713_v45  ;;  %v799_v35 = vmul.f32 %v2307_v29, %v792_v14 }
 0x1ad   : > { %v920_v57 = vpop.permute.xlu0 %919  ;;  %v852_v15 = vsub.f32 %v3296_v43, %v3390_v42  ;;  %v855_v42 = vsub.f32 %v3307_v52, %v3385_v9 }
 0x1ae   : > { %v928_v45 = vsub.f32 %v3303_v50, %v920_v57  ;;  %v804_v14 = vadd.f32 %v799_v35, %v787_v28 }
 0x1af   : > { %v867_v47 = vmul.f32 %v855_v42, %v855_v42  ;;  %v789_v42 = vmul.f32 0.6931472, %v3411_v48 }
 0x1b0   : > { %v3397_v58 = vpop.permute.xlu1 %845 }
 0x1b1   : > { %v2317_v40 = vpop.eup %2316  ;;  %v854_v13 = vsub.f32 %v3303_v50, %v3397_v58  ;;  %v938_v58 = vmul.f32 %v926_v62, %v926_v62 }
 0x1b2   : > { %v2319_v63 = vpop.eup %2318  ;;  %v859_v8 = vmul.f32 0.6931472, %v2317_v40 }
 0x1b3   : > { %v2321_v60 = vpop.eup %2320  ;;  %v866_v36 = vmul.f32 %v854_v13, %v854_v13 }
 0x1b4   : > { %v2323_v22 = vpop.eup %2322 }
 0x1b5   : > { %v892_v0 = vpop.permute.xlu1 %891  ;;  %v2325_v27 = vpop.eup %2324 }
 0x1b6   : > { %v906_v20 = vadd.f32 %v3283_v31, %v892_v0  ;;  %v864_v0 = vmul.f32 %v852_v15, %v852_v15  ;;  %v2327_v33 = vpop.eup %2326  ;;  %v933_v15 = vmul.f32 0.6931472, %v2321_v60  ;;  %v861_v16 = vmul.f32 0.6931472, %v2325_v27 }
 0x1b7   : > { %v873_v13 = vmul.f32 %v2327_v33, %v866_v36  ;;  %v801_v60 = vmul.f32 %v3414_v6, %v793_v32 }
 0x1b8   : > { %2328 = vlog2.f32 %v906_v20  ;;  %v869_v44 = vmul.f32 %v2311_v41, %v864_v0 }
 0x1b9   : > { %2330 = vrcp.f32 %v906_v20  ;;  %v900_v23 = vpop.permute.xlu1 %899  ;;  %v966_v20 = vpop.permute.xlu0 %965  ;;  %v878_v36 = vadd.f32 %v873_v13, %v861_v16 }
 0x1ba   : > { %2332 = vlog2.f32 %v835_v21  ;;  %v908_v38 = vadd.f32 %v3281_v30, %v900_v23  ;;  %v980_v1 = vadd.f32 %v3283_v31, %v966_v20  ;;  %v876_v0 = vadd.f32 %v869_v44, %v857_v46 }
 0x1bb   : > { %2334 = vrcp.f32 %v835_v21  ;;  %v802_v21 = vadd.f32 %v795_v12, %v783_v11  ;;  %v733_v20 = vadd.f32 %v732_v5, %v730_v26 }
 0x1bc   : > { %2336 = vlog2.f32 %v908_v38 }
 0x1bd   : > { %2338 = vrcp.f32 %v908_v38  ;;  %v904_v17 = vpop.permute.xlu1 %903  ;;  %v806_v56 = vadd.f32 %v803_v7, %v802_v21  ;;  %v871_v38 = vmul.f32 %v2319_v63, %v865_v10  ;;  %v978_v40 = vpop.permute.xlu0 %977 }
 0x1be   : > { %v909_v55 = vadd.f32 %v3286_v34, %v904_v17  ;;  %v983_v32 = vadd.f32 %v3286_v34, %v978_v40 }
 0x1bf   : > { %v877_v10 = vadd.f32 %v871_v38, %v859_v8  ;;  %v807_v8 = vadd.f32 %v806_v56, %v804_v14  ;;  %v805_v38 = vadd.f32 %v801_v60, %v789_v42 }
 0x1c0   : > { %2340 = vlog2.f32 %v909_v55 }
 0x1c1   : > { %2342 = vrcp.f32 %v909_v55  ;;  %v916_v39 = vpop.permute.xlu1 %915  ;;  %v940_v55 = vmul.f32 %v928_v45, %v928_v45  ;;  %v990_v5 = vpop.permute.xlu0 %989 }
 0x1c2   : > { %v2329_v9 = vpop.eup %2328  ;;  %v927_v23 = vsub.f32 %v3305_v51, %v916_v39  ;;  %2344 = vlog2.f32 %v980_v1  ;;  %v1001_v13 = vsub.f32 %v3305_v51, %v990_v5 }
 0x1c3   : > { %v2331_v49 = vpop.eup %2330  ;;  %v931_v11 = vmul.f32 0.6931472, %v2329_v9  ;;  %2346 = vrcp.f32 %v980_v1 }
 0x1c4   : > { %v2333_v53 = vpop.eup %2332  ;;  %v943_v29 = vmul.f32 %v2331_v49, %v938_v58  ;;  %v939_v12 = vmul.f32 %v927_v23, %v927_v23  ;;  %v880_v49 = vadd.f32 %v877_v10, %v876_v0  ;;  %v1013_v10 = vmul.f32 %v1001_v13, %v1001_v13 }
 0x1c5   : > { %v2335_v62 = vpop.eup %2334  ;;  %v924_v17 = vpop.permute.xlu1 %923  ;;  %v863_v35 = vmul.f32 0.6931472, %v2333_v53  ;;  %v734_v53 = vadd.f32 %v733_v20, %v3425_v19 }
 0x1c6   : > { %v2337_v57 = vpop.eup %2336  ;;  %v945_v7 = vmul.f32 %v2323_v22, %v939_v12  ;;  %v929_v41 = vsub.f32 %v3307_v52, %v924_v17  ;;  %v950_v28 = vadd.f32 %v943_v29, %v931_v11  ;;  %v875_v39 = vmul.f32 %v2335_v62, %v867_v47  ;;  %v998_v1 = vpop.permute.xlu0 %997 }
 0x1c7   : > { %v2339_v63 = vpop.eup %2338  ;;  %v935_v21 = vmul.f32 0.6931472, %v2337_v57  ;;  %v881_v26 = vadd.f32 %v880_v49, %v878_v36  ;;  %v808_v62 = vadd.f32 %v807_v8, %v805_v38  ;;  %v735_v56 = vrot.slane %v734_v53, 4 }
 0x1c8   : > { %v947_v27 = vmul.f32 %v2339_v63, %v940_v55  ;;  %v951_v58 = vadd.f32 %v945_v7, %v933_v15  ;;  %v941_v33 = vmul.f32 %v929_v41, %v929_v41  ;;  %v879_v29 = vadd.f32 %v875_v39, %v863_v35 }
 0x1c9   : > { %v809_v55 = vrot.slane %v808_v62, 4  ;;  %v1003_v40 = vsub.f32 %v3307_v52, %v998_v1  ;;  %v736_v63 = vadd.f32 %v735_v56, %v734_v53  ;;  %v2840_v36 = vmov 15  }
 0x1ca   : > { %v2341_v48 = vpop.eup %2340  ;;  %v952_v22 = vadd.f32 %v947_v27, %v935_v21  ;;  %v954_v9 = vadd.f32 %v951_v58, %v950_v28  ;;  %v970_v45 = vpop.permute.xlu1 %969  ;;  %v882_v16 = vadd.f32 %v881_v26, %v879_v29  ;;  %2211 = vset.pattern.permute.xlu0 %v2840_v36  ;;  %v3448_v29 = vld [vmem:[#allocation7] sm:$0xff] }
 0x1cb   : > { %v2343_v23 = vpop.eup %2342  ;;  %v937_v6 = vmul.f32 0.6931472, %v2341_v48  ;;  %v981_v46 = vadd.f32 %v3290_v37, %v970_v45  ;;  %v810_v20 = vadd.f32 %v809_v55, %v808_v62 }
 0x1cc   : > { %v949_v44 = vmul.f32 %v2343_v23, %v941_v33  ;;  %v955_v15 = vadd.f32 %v954_v9, %v952_v22  ;;  %v2345_v19 = vpop.eup %2344  ;;  %v883_v7 = vrot.slane %v882_v16, 4  ;;  %v1015_v9 = vmul.f32 %v1003_v40, %v1003_v40  ;;  %v3445_v23 = vld [vmem:[#allocation8 + $0x10] sm:$0xff] }
 0x1cd   : > { %2348 = vlog2.f32 %v981_v46  ;;  %v2347_v42 = vpop.eup %2346  ;;  %v1005_v28 = vmul.f32 0.6931472, %v2345_v19  ;;  %1603 = vperm.xlu0 %2211, %v3445_v23   ;;  %v811_v5 = vrot.slane %v810_v20, 2 }
 0x1ce   : > { %v953_v47 = vadd.f32 %v949_v44, %v937_v6  ;;  %2350 = vrcp.f32 %v981_v46  ;;  %v974_v11 = vpop.permute.xlu1 %973  ;;  %v884_v39 = vadd.f32 %v883_v7, %v882_v16  ;;  %v737_v46 = vrot.slane %v736_v63, 2 }
 0x1cf   : > { %2352 = vlog2.f32 %v983_v32  ;;  %v982_v12 = vadd.f32 %v3281_v30, %v974_v11 }
 0x1d0   : > { %2354 = vrcp.f32 %v983_v32  ;;  %v956_v14 = vadd.f32 %v955_v15, %v953_v47  ;;  %v885_v53 = vrot.slane %v884_v39, 2  ;;  %v738_v62 = vadd.f32 %v737_v46, %v736_v63  ;;  %v2498_v46 = vld [vmem:[#allocation8] sm:$0xff] }
 0x1d1   : > { %2356 = vlog2.f32 %v982_v12  ;;  %1615 = vperm.xlu0 %2211, %v3448_v29  }
 0x1d2   : > { %2358 = vrcp.f32 %v982_v12  ;;  %v986_v17 = vpop.permute.xlu1 %985  ;;  %v957_v60 = vrot.slane %v956_v14, 4 }
 0x1d3   : > { %v1000_v57 = vsub.f32 %v3296_v43, %v986_v17  ;;  %v886_v17 = vadd.f32 %v885_v53, %v884_v39 }
 0x1d4   : > { %v958_v6 = vadd.f32 %v957_v60, %v956_v14  ;;  %v812_v14 = vadd.f32 %v811_v5, %v810_v20 }
 0x1d5   : > { %v1012_v41 = vmul.f32 %v1000_v57, %v1000_v57  ;;  %2216 = vset.pattern.permute.xlu0 %v2825_v4  ;;  %v739_v57 = vrot.slane %v738_v62, 1  ;;  %v887_v40 = vrot.slane %v886_v17, 1 }
 0x1d6   : > { %v994_v0 = vpop.permute.xlu1 %993  ;;  %v959_v12 = vrot.slane %v958_v6, 2  ;;  %v813_v55 = vrot.slane %v812_v14, 1 }
 0x1d7   : > { %v2349_v21 = vpop.eup %2348  ;;  %v1017_v27 = vmul.f32 %v2347_v42, %v1012_v41  ;;  %v1002_v58 = vsub.f32 %v3303_v50, %v994_v0  ;;  %v740_v60 = vadd.f32 %v739_v57, %v738_v62  ;;  %v3511_v62 = vld [vmem:[%s3191_s11] sm:$0xff] }
 0x1d8   : > { %v2351_v33 = vpop.eup %2350  ;;  %v1007_v35 = vmul.f32 0.6931472, %v2349_v21  ;;  %v960_v19 = vadd.f32 %v959_v12, %v958_v6  ;;  %v814_v0 = vadd.f32 %v813_v55, %v812_v14  ;;  %v888_v21 = vadd.f32 %v887_v40, %v886_v17 }
 0x1d9   : > { %v2353_v48 = vpop.eup %2352  ;;  %v1019_v22 = vmul.f32 %v2351_v33, %v1013_v10  ;;  %v1014_v45 = vmul.f32 %v1002_v58, %v1002_v58  ;;  %v1024_v38 = vadd.f32 %v1017_v27, %v1005_v28  ;;  %v741_v27 = vmul.f32 -0.5, %v740_v60 }
 0x1da   : > { %v2355_v49 = vpop.eup %2354  ;;  %v1011_v47 = vmul.f32 0.6931472, %v2353_v48  ;;  %v961_v41 = vrot.slane %v960_v19, 1  ;;  %v815_v33 = vmul.f32 -0.5, %v814_v0  ;;  %v889_v20 = vmul.f32 -0.5, %v888_v21 }
 0x1db   : > { %v2357_v32 = vpop.eup %2356  ;;  %v1025_v8 = vadd.f32 %v1019_v22, %v1007_v35  ;;  %v1023_v15 = vmul.f32 %v2355_v49, %v1015_v9  ;;  %v1043_v22 = vsel %vm1042_vm3, %v3363_v18, %v741_v27  ;;  %v2499_v18 = vld [vmem:[#allocation8 + $0x8] sm:$0xff] }
 0x1dc   : > { %v2359_v44 = vpop.eup %2358  ;;  %v1009_v26 = vmul.f32 0.6931472, %v2357_v32  ;;  %v962_v28 = vadd.f32 %v961_v41, %v960_v19  ;;  %v1045_v9 = vsel %vm1044_vm4, %v1043_v22, %v815_v33  ;;  %v3546_v41 = vld [vmem:[#allocation7 + $0x18] sm:$0xff] }
 0x1dd   : > { %v1021_v11 = vmul.f32 %v2359_v44, %v1014_v45  ;;  %v1028_v16 = vadd.f32 %v1025_v8, %v1024_v38  ;;  %v1027_v13 = vadd.f32 %v1023_v15, %v1011_v47  ;;  %v1047_v49 = vsel %vm1046_vm5, %v1045_v9, %v889_v20  ;;  %v2500_v8 = vld [vmem:[#allocation8 + $0x18] sm:$0xff]  ;;  %v3480_v38 = vpop.permute.xlu0 %1521 }
 0x1de   : > { %v963_v48 = vmul.f32 -0.5, %v962_v28 }
 0x1df   : > { %v1026_v56 = vadd.f32 %v1021_v11, %v1009_v26  ;;  %v3500_v11 = vld [vmem:[#allocation7 + $0x8] sm:$0xff] }
 0x1e0   : > { %v1049_v6 = vsel %vm1048_vm6, %v1047_v49, %v963_v48 }
 0x1e1   : > { %v1029_v1 = vadd.f32 %v1028_v16, %v1026_v56  ;;  %v3483_v44 = vpop.permute.xlu0 %1451 }
 0x1e3   : > { %v1030_v42 = vadd.f32 %v1029_v1, %v1027_v13 }
 0x1e5   : > { %v1031_v7 = vrot.slane %v1030_v42, 4  ;;  %v3486_v5 = vpop.permute.xlu0 %1455 }
 0x1e7   : > { %v1032_v10 = vadd.f32 %v1031_v7, %v1030_v42  ;;  %v3535_v42 = vld [vmem:[#allocation7 + $0x10] sm:$0xff] }
 0x1e9   : > { %v1033_v63 = vrot.slane %v1032_v10, 2 }
 0x1ea   : > { %v3489_v26 = vpop.permute.xlu0 %1163 }
 0x1eb   : > { %v1034_v58 = vadd.f32 %v1033_v63, %v1032_v10 }
 0x1ed   : > { %v1035_v35 = vrot.slane %v1034_v58, 1 }
 0x1ee   : > { %v1172_v53 = vpop.permute.xlu0 %1171 }
 0x1ef   : > { %v1036_v39 = vadd.f32 %v1035_v35, %v1034_v58  ;;  %v1186_v7 = vsub.f32 %v3296_v43, %v1172_v53 }
 0x1f1   : > { %v1037_v45 = vmul.f32 -0.5, %v1036_v39  ;;  %v1198_v0 = vmul.f32 %v1186_v7, %v1186_v7 }
 0x1f3   : > { %v3458_v32 = vsel %vm1050_vm7, %v1049_v6, %v1037_v45  ;;  %v3494_v47 = vpop.permute.xlu0 %1081 }
 0x1f4   : > { %1053 = vmax.xlane.f32.xlu1 %v3458_v32  ;;  %1052 = vst [vmem:[%s3189_s14] sm:$0xff] %v3458_v32 }
 0x1f7   : > { %v3498_v15 = vpop.permute.xlu0 %1105 }
 0x205   : > { %1077 = vperm.xlu1 %2174, %v2498_v46  }
 0x209   : > { %2175 = vset.pattern.permute.xlu1 %v2835_v54 }
 0x20a   : > { %1151 = vperm.xlu1 %2175, %v2498_v46  }
 0x20e   : > { %1155 = vperm.xlu1 %2175, %v2499_v18  }
 0x212   : > { %2176 = vset.pattern.permute.xlu1 %v2839_v24 }
 0x213   : > { %1225 = vperm.xlu1 %2176, %v2498_v46  }
 0x217   : > { %1229 = vperm.xlu1 %2176, %v2499_v18  }
 0x21b   : > { %2177 = vset.pattern.permute.xlu1 %v2836_v2 }
 0x21c   : > { %1085 = vperm.xlu1 %2177, %v3445_v23  }
 0x220   : > { %2178 = vset.pattern.permute.xlu1 %v2835_v54 }
 0x221   : > { %1159 = vperm.xlu1 %2178, %v3445_v23  }
 0x225   : > { %2179 = vset.pattern.permute.xlu1 %v2838_v3 }
 0x226   : > { %1299 = vperm.xlu1 %2179, %v2498_v46  }
 0x22a   : > { %1303 = vperm.xlu1 %2179, %v2499_v18  }
 0x22e   : > { %2180 = vset.pattern.permute.xlu1 %v2839_v24 }
 0x22f   : > { %1233 = vperm.xlu1 %2180, %v3445_v23  }
 0x233   : > { %2181 = vset.pattern.permute.xlu1 %v2837_v61 }
 0x234   : > { %1377 = vperm.xlu1 %2181, %v2499_v18  }
 0x238   : > { %2182 = vset.pattern.permute.xlu1 %v2836_v2 }
 0x239   : > { %1089 = vperm.xlu1 %2182, %v2500_v8  }
 0x23d   : > { %2183 = vset.pattern.permute.xlu1 %v2838_v3 }
 0x23e   : > { %1307 = vperm.xlu1 %2183, %v3445_v23  }
 0x242   : > { %2184 = vset.pattern.permute.xlu1 %v2834_v25 }
 0x243   : > { %1447 = vperm.xlu1 %2184, %v2498_v46  }
 0x247   : > { %2185 = vset.pattern.permute.xlu1 %v2839_v24 }
 0x248   : > { %1237 = vperm.xlu1 %2185, %v2500_v8  }
 0x24c   : > { %2186 = vset.pattern.permute.xlu1 %v2837_v61 }
 0x24d   : > { %1381 = vperm.xlu1 %2186, %v3445_v23  }
 0x251   : > { %2189 = vset.pattern.permute.xlu1 %v2833_v59 }
 0x252   : > { %1525 = vperm.xlu1 %2189, %v2499_v18  }
 0x256   : > { %2190 = vset.pattern.permute.xlu1 %v2838_v3 }
 0x257   : > { %1311 = vperm.xlu1 %2190, %v2500_v8  }
 0x25b   : > { %2192 = vset.pattern.permute.xlu1 %v2840_v36 }
 0x25c   : > { %1595 = vperm.xlu1 %2192, %v2498_v46   ;;  %v1114_v46 = vsub.f32 %v3303_v50, %v3498_v15 }
 0x25e   : > { %v1126_v53 = vmul.f32 %v1114_v46, %v1114_v46 }
 0x260   : > { %1599 = vperm.xlu1 %2192, %v2499_v18  }
 0x264   : > { %2193 = vset.pattern.permute.xlu1 %v2833_v59 }
 0x265   : > { %1529 = vperm.xlu1 %2193, %v3445_v23   ;;  %v3505_v23 = vpop.permute.xlu0 %1373 }
 0x269   : > { %2194 = vset.pattern.permute.xlu1 %v2834_v25  ;;  %v3508_v12 = vpop.permute.xlu0 %1385 }
 0x26a   : > { %1459 = vperm.xlu1 %2194, %v2500_v8  }
 0x26d   : > { %v3524_v13 = vpop.permute.xlu0 %1397 }
 0x26e   : > { %2195 = vset.pattern.permute.xlu1 %v2836_v2 }
 0x26f   : > { %1097 = vperm.xlu1 %2195, %v3448_v29  }
 0x271   : > { %v3532_v57 = vpop.permute.xlu0 %1323 }
 0x273   : > { %1101 = vperm.xlu1 %2195, %v3500_v11  }
 0x275   : > { %v3543_v40 = vpop.permute.xlu0 %1327 }
 0x277   : > { %2197 = vset.pattern.permute.xlu1 %v2835_v54 }
 0x278   : > { %1175 = vperm.xlu1 %2197, %v3500_v11  }
 0x279   : > { %v1246_v28 = vpop.permute.xlu0 %1245 }
 0x27a   : > { %v1260_v20 = vsub.f32 %v3296_v43, %v1246_v28 }
 0x27c   : > { %2198 = vset.pattern.permute.xlu1 %v2833_v59  ;;  %v1272_v39 = vmul.f32 %v1260_v20, %v1260_v20 }
 0x27d   : > { %1533 = vperm.xlu1 %2198, %v2500_v8  }
 0x281   : > { %2199 = vset.pattern.permute.xlu1 %v2839_v24  ;;  %v1054_v16 = vpop.xlane.xlu1 %1053 }
 0x282   : > { %v3515_v56 = vmax.f32 %v3511_v62, %v1054_v16  ;;  %1249 = vperm.xlu1 %2199, %v3500_v11  }
 0x284   : > { %v1068_v14 = vsub.f32 %v3511_v62, %v3515_v56  ;;  %1075 = vst.msk [vmem:[%s3191_s11] sm:$0xff] %vm1073_vm8, %v3515_v56  ;;  %1059 = vperm.xlu0 %2216, %v3515_v56  }
 0x285   : > { %v3526_v1 = vpop.permute.xlu1 %1077 }
 0x286   : > { %2200 = vset.pattern.permute.xlu1 %v2840_v36 }
 0x287   : > { %1607 = vperm.xlu1 %2200, %v2500_v8  }
 0x288   : > { %2217 = vset.pattern.permute.xlu0 %v2833_v59 }
 0x289   : > { %1545 = vperm.xlu0 %2217, %v3500_v11   ;;  %v1152_v17 = vpop.permute.xlu1 %1151 }
 0x28a   : > { %v1166_v19 = vadd.f32 %v3283_v31, %v1152_v17 }
 0x28b   : > { %2202 = vset.pattern.permute.xlu1 %v2835_v54 }
 0x28c   : > { %2360 = vlog2.f32 %v1166_v19  ;;  %1179 = vperm.xlu1 %2202, %v3535_v42  }
 0x28d   : > { %2362 = vrcp.f32 %v1166_v19  ;;  %1549 = vperm.xlu0 %2217, %v3535_v42   ;;  %v3539_v55 = vpop.permute.xlu1 %1155 }
 0x290   : > { %2203 = vset.pattern.permute.xlu1 %v2838_v3 }
 0x291   : > { %1319 = vperm.xlu1 %2203, %v3448_v29   ;;  %1553 = vperm.xlu0 %2217, %v3546_v41  }
 0x292   : > { %v1226_v60 = vpop.permute.xlu1 %1225 }
 0x293   : > { %v1240_v10 = vadd.f32 %v3283_v31, %v1226_v60 }
 0x295   : > { %2364 = vlog2.f32 %v1240_v10  ;;  %2204 = vset.pattern.permute.xlu1 %v2839_v24  ;;  %2223 = vset.pattern.permute.xlu0 %v2825_v4 }
 0x296   : > { %v2361_v21 = vpop.eup %2360  ;;  %2366 = vrcp.f32 %v1240_v10  ;;  %1253 = vperm.xlu1 %2204, %v3535_v42   ;;  %v3553_v63 = vpop.permute.xlu1 %1229  ;;  %v1335_v10 = vsub.f32 %v3305_v51, %v3532_v57  ;;  %v1409_v57 = vsub.f32 %v3305_v51, %v3524_v13 }
 0x297   : > { %v2363_v27 = vpop.eup %2362  ;;  %v1191_v58 = vmul.f32 0.6931472, %v2361_v21 }
 0x298   : > { %v1203_v33 = vmul.f32 %v2363_v27, %v1198_v0  ;;  %v1347_v21 = vmul.f32 %v1335_v10, %v1335_v10 }
 0x29a   : > { %v3556_v35 = vadd.f32 %v1203_v33, %v1191_v58  ;;  %2205 = vset.pattern.permute.xlu1 %v2837_v61 }
 0x29b   : > { %1393 = vperm.xlu1 %2205, %v3448_v29   ;;  %v1086_v24 = vpop.permute.xlu1 %1085 }
 0x29c   : > { %v1094_v48 = vadd.f32 %v3281_v30, %v1086_v24 }
 0x29e   : > { %2368 = vlog2.f32 %v1094_v48 }
 0x29f   : > { %v2365_v22 = vpop.eup %2364  ;;  %2370 = vrcp.f32 %v1094_v48  ;;  %2207 = vset.pattern.permute.xlu1 %v2836_v2 }
 0x2a0   : > { %v2367_v9 = vpop.eup %2366  ;;  %v1265_v45 = vmul.f32 0.6931472, %v2365_v22  ;;  %1109 = vperm.xlu1 %2207, %v3546_v41   ;;  %v3563_v49 = vpop.permute.xlu1 %1159  ;;  %v1421_v22 = vmul.f32 %v1409_v57, %v1409_v57 }
 0x2a1   : > { %v1277_v6 = vmul.f32 %v2367_v9, %v1272_v39 }
 0x2a3   : > { %v3567_v18 = vadd.f32 %v1277_v6, %v1265_v45 }
 0x2a4   : > { %2208 = vset.pattern.permute.xlu1 %v2835_v54 }
 0x2a5   : > { %1183 = vperm.xlu1 %2208, %v3546_v41   ;;  %v3571_v8 = vpop.permute.xlu1 %1299 }
 0x2a8   : > { %v2369_v2 = vpop.eup %2368 }
 0x2a9   : > { %v2371_v16 = vpop.eup %2370  ;;  %v1121_v17 = vmul.f32 0.6931472, %v2369_v2  ;;  %2210 = vset.pattern.permute.xlu1 %v2834_v25  ;;  %v1304_v19 = vpop.permute.xlu1 %1303 }
 0x2aa   : > { %v1133_v7 = vmul.f32 %v2371_v16, %v1126_v53  ;;  %v1315_v60 = vadd.f32 %v3290_v37, %v1304_v19  ;;  %1467 = vperm.xlu1 %2210, %v3448_v29  }
 0x2ac   : > { %v3576_v15 = vadd.f32 %v1133_v7, %v1121_v17  ;;  %2372 = vlog2.f32 %v1315_v60 }
 0x2ad   : > { %2374 = vrcp.f32 %v1315_v60  ;;  %v1258_v60 = vpop.permute.xlu0 %1257 }
 0x2ae   : > { %1471 = vperm.xlu1 %2210, %v3500_v11   ;;  %v3579_v54 = vpop.permute.xlu1 %1233 }
 0x2b2   : > { %2212 = vset.pattern.permute.xlu1 %v2837_v61 }
 0x2b3   : > { %1401 = vperm.xlu1 %2212, %v3535_v42   ;;  %v1378_v0 = vpop.permute.xlu1 %1377 }
 0x2b4   : > { %v1389_v28 = vadd.f32 %v3290_v37, %v1378_v0 }
 0x2b6   : > { %v2373_v27 = vpop.eup %2372  ;;  %2376 = vlog2.f32 %v1389_v28 }
 0x2b7   : > { %v2375_v58 = vpop.eup %2374  ;;  %v1341_v33 = vmul.f32 0.6931472, %v2373_v27  ;;  %2378 = vrcp.f32 %v1389_v28  ;;  %2213 = vset.pattern.permute.xlu1 %v2833_v59 }
 0x2b8   : > { %v1353_v20 = vmul.f32 %v2375_v58, %v1347_v21  ;;  %1541 = vperm.xlu1 %2213, %v3448_v29   ;;  %v3588_v24 = vpop.permute.xlu1 %1089 }
 0x2ba   : > { %v3592_v48 = vadd.f32 %v1353_v20, %v1341_v33 }
 0x2bc   : > { %2214 = vset.pattern.permute.xlu1 %v2838_v3  ;;  %v1336_v3 = vsub.f32 %v3303_v50, %v3543_v40 }
 0x2bd   : > { %1331 = vperm.xlu1 %2214, %v3546_v41   ;;  %v1308_v39 = vpop.permute.xlu1 %1307 }
 0x2be   : > { %v1316_v9 = vadd.f32 %v3281_v30, %v1308_v39  ;;  %v1348_v2 = vmul.f32 %v1336_v3, %v1336_v3 }
 0x2c0   : > { %v2377_v45 = vpop.eup %2376  ;;  %2380 = vlog2.f32 %v1316_v9 }
 0x2c1   : > { %v2379_v59 = vpop.eup %2378  ;;  %v1415_v6 = vmul.f32 0.6931472, %v2377_v45  ;;  %2382 = vrcp.f32 %v1316_v9  ;;  %2215 = vset.pattern.permute.xlu1 %v2834_v25 }
 0x2c2   : > { %v1427_v29 = vmul.f32 %v2379_v59, %v1421_v22  ;;  %1475 = vperm.xlu1 %2215, %v3535_v42   ;;  %v3599_v13 = vpop.permute.xlu1 %1447  ;;  %v1092_v22 = vadd.f32 %v3283_v31, %v3526_v1 }
 0x2c4   : > { %v3603_v46 = vadd.f32 %v1427_v29, %v1415_v6 }
 0x2c6   : > { %2218 = vset.pattern.permute.xlu1 %v2840_v36 }
 0x2c7   : > { %1619 = vperm.xlu1 %2218, %v3500_v11   ;;  %v1238_v53 = vpop.permute.xlu1 %1237  ;;  %v1263_v11 = vsub.f32 %v3307_v52, %v1258_v60 }
 0x2c8   : > { %v1243_v16 = vadd.f32 %v3286_v34, %v1238_v53 }
 0x2c9   : > { %v1275_v28 = vmul.f32 %v1263_v11, %v1263_v11 }
 0x2ca   : > { %v2381_v17 = vpop.eup %2380  ;;  %2384 = vlog2.f32 %v1243_v16 }
 0x2cb   : > { %v2383_v19 = vpop.eup %2382  ;;  %v1343_v7 = vmul.f32 0.6931472, %v2381_v17  ;;  %2386 = vrcp.f32 %v1243_v16  ;;  %2219 = vset.pattern.permute.xlu1 %v2837_v61 }
 0x2cc   : > { %v1355_v10 = vmul.f32 %v2383_v19, %v1348_v2  ;;  %1405 = vperm.xlu1 %2219, %v3546_v41   ;;  %v3610_v40 = vpop.permute.xlu1 %1381  ;;  %2388 = vlog2.f32 %v1092_v22  ;;  %v1241_v19 = vadd.f32 %v3290_v37, %v3553_v63 }
 0x2ce   : > { %v3612_v0 = vadd.f32 %v1355_v10, %v1343_v7 }
 0x2d0   : > { %2220 = vset.pattern.permute.xlu1 %v2834_v25 }
 0x2d1   : > { %1479 = vperm.xlu1 %2220, %v3546_v41   ;;  %v3617_v21 = vpop.permute.xlu1 %1525 }
 0x2d4   : > { %v2385_v27 = vpop.eup %2384 }
 0x2d5   : > { %v2387_v58 = vpop.eup %2386  ;;  %v1271_v61 = vmul.f32 0.6931472, %v2385_v27  ;;  %2221 = vset.pattern.permute.xlu1 %v2840_v36  ;;  %v1093_v36 = vadd.f32 %v3290_v37, %v3494_v47  ;;  %v3646_v27 = vpop.permute.xlu0 %1603 }
 0x2d6   : > { %v1283_v33 = vmul.f32 %v2387_v58, %v1275_v28  ;;  %1623 = vperm.xlu1 %2221, %v3535_v42   ;;  %v3621_v20 = vpop.permute.xlu1 %1311  ;;  %v2389_v59 = vpop.eup %2388 }
 0x2d7   : > { %2390 = vlog2.f32 %v1093_v36  ;;  %v1117_v3 = vmul.f32 0.6931472, %v2389_v59  ;;  %v1168_v59 = vadd.f32 %v3281_v30, %v3563_v49 }
 0x2d8   : > { %v3623_v57 = vadd.f32 %v1283_v33, %v1271_v61  ;;  %2392 = vrcp.f32 %v1092_v22 }
 0x2d9   : > { %2394 = vrcp.f32 %v1093_v36 }
 0x2da   : > { %1627 = vperm.xlu1 %2221, %v3546_v41   ;;  %v1167_v41 = vadd.f32 %v3290_v37, %v3539_v55 }
 0x2db   : > { %v3626_v25 = vpop.permute.xlu1 %1595 }
 0x2dc   : > { %2396 = vlog2.f32 %v1167_v41 }
 0x2dd   : > { %2398 = vrcp.f32 %v1167_v41 }
 0x2de   : > { %2222 = vset.pattern.permute.xlu1 %v2825_v4  ;;  %2400 = vlog2.f32 %v1241_v19 }
 0x2df   : > { %v3629_v39 = vpop.permute.xlu1 %1599  ;;  %2402 = vrcp.f32 %v1241_v19 }
 0x2e0   : > { %2404 = vlog2.f32 %v1168_v59 }
 0x2e1   : > { %v2391_v1 = vpop.eup %2390  ;;  %2406 = vrcp.f32 %v1168_v59 }
 0x2e2   : > { %v2393_v47 = vpop.eup %2392  ;;  %v1119_v17 = vmul.f32 0.6931472, %v2391_v1  ;;  %v3655_v1 = vpop.permute.xlu0 %1615 }
 0x2e3   : > { %v2395_v16 = vpop.eup %2394 }
 0x2e4   : > { %v3635_v9 = vpop.permute.xlu1 %1529 }
 0x2e6   : > { %v2397_v28 = vpop.eup %2396 }
 0x2e7   : > { %v2399_v33 = vpop.eup %2398  ;;  %v1193_v36 = vmul.f32 0.6931472, %v2397_v28 }
 0x2e9   : > { %v3637_v42 = vpop.permute.xlu1 %1459 }
 0x2ee   : > { %v1098_v4 = vpop.permute.xlu1 %1097 }
 0x2ef   : > { %v1112_v45 = vsub.f32 %v3296_v43, %v1098_v4 }
 0x2f1   : > { %v1124_v6 = vmul.f32 %v1112_v45, %v1112_v45 }
 0x2f2   : > { %v1102_v29 = vpop.permute.xlu1 %1101 }
 0x2f3   : > { %v1129_v53 = vmul.f32 %v2393_v47, %v1124_v6  ;;  %v1113_v2 = vsub.f32 %v3305_v51, %v1102_v29 }
 0x2f5   : > { %v1136_v55 = vadd.f32 %v1129_v53, %v1117_v3  ;;  %v1125_v7 = vmul.f32 %v1113_v2, %v1113_v2  ;;  %v2401_v3 = vpop.eup %2400  ;;  %v1314_v53 = vadd.f32 %v3283_v31, %v3571_v8 }
 0x2f6   : > { %v1267_v19 = vmul.f32 0.6931472, %v2401_v3 }
 0x2f7   : > { %v1131_v60 = vmul.f32 %v2395_v16, %v1125_v7  ;;  %v1176_v10 = vpop.permute.xlu1 %1175  ;;  %2408 = vlog2.f32 %v1314_v53 }
 0x2f8   : > { %v1187_v11 = vsub.f32 %v3305_v51, %v1176_v10 }
 0x2f9   : > { %v1137_v58 = vadd.f32 %v1131_v60, %v1119_v17  ;;  %v2403_v17 = vpop.eup %2402  ;;  %v1242_v60 = vadd.f32 %v3281_v30, %v3579_v54 }
 0x2fa   : > { %v1199_v61 = vmul.f32 %v1187_v11, %v1187_v11  ;;  %v2405_v28 = vpop.eup %2404 }
 0x2fb   : > { %v1140_v22 = vadd.f32 %v1137_v58, %v1136_v55 }
 0x2fc   : > { %v1205_v41 = vmul.f32 %v2399_v33, %v1199_v61  ;;  %v3648_v4 = vpop.permute.xlu1 %1533  ;;  %v2407_v61 = vpop.eup %2406  ;;  %v1195_v33 = vmul.f32 0.6931472, %v2405_v28 }
 0x2fd   : > { %v3651_v63 = vadd.f32 %v1140_v22, %v3576_v15 }
 0x2fe   : > { %v1211_v45 = vadd.f32 %v1205_v41, %v1193_v36 }
 0x300   : > { %v1214_v6 = vadd.f32 %v1211_v45, %v3556_v35 }
 0x301   : > { %v1250_v47 = vpop.permute.xlu1 %1249  ;;  %v2409_v41 = vpop.eup %2408 }
 0x302   : > { %v1261_v29 = vsub.f32 %v3305_v51, %v1250_v47  ;;  %v1339_v3 = vmul.f32 0.6931472, %v2409_v41  ;;  %v1462_v41 = vadd.f32 %v3283_v31, %v3599_v13 }
 0x303   : > { %v1060_v2 = vpop.permute.xlu0 %1059 }
 0x304   : > { %v1273_v16 = vmul.f32 %v1261_v29, %v1261_v29  ;;  %v1062_v15 = vsub.f32 %v3458_v32, %v1060_v2  ;;  %v1388_v32 = vadd.f32 %v3283_v31, %v3505_v23  ;;  %v1095_v23 = vadd.f32 %v3286_v34, %v3588_v24 }
 0x306   : > { %v1279_v49 = vmul.f32 %v2403_v17, %v1273_v16  ;;  %v1063_v55 = vmul.f32 1.442695, %v1062_v15  ;;  %v3662_v7 = vpop.permute.xlu1 %1607 }
 0x308   : > { %v1285_v35 = vadd.f32 %v1279_v49, %v1267_v19  ;;  %2410 = vpow2.f32 %v1063_v55  ;;  %v1169_v19 = vadd.f32 %v3286_v34, %v3489_v26 }
 0x309   : > { %2412 = vrcp.f32 %v1314_v53 }
 0x30a   : > { %v1288_v8 = vadd.f32 %v1285_v35, %v3567_v18  ;;  %2414 = vlog2.f32 %v1242_v60 }
 0x30b   : > { %v1180_v10 = vpop.permute.xlu1 %1179  ;;  %2416 = vrcp.f32 %v1242_v60 }
 0x30c   : > { %v1188_v11 = vsub.f32 %v3303_v50, %v1180_v10  ;;  %2418 = vlog2.f32 %v1388_v32 }
 0x30d   : > { %2420 = vrcp.f32 %v1388_v32 }
 0x30e   : > { %v1200_v58 = vmul.f32 %v1188_v11, %v1188_v11  ;;  %2422 = vlog2.f32 %v1095_v23 }
 0x30f   : > { %2424 = vrcp.f32 %v1095_v23  ;;  %v1536_v23 = vadd.f32 %v3283_v31, %v3480_v38  ;;  %v1390_v38 = vadd.f32 %v3281_v30, %v3610_v40  ;;  %v1317_v40 = vadd.f32 %v3286_v34, %v3621_v20 }
 0x310   : > { %v1207_v22 = vmul.f32 %v2407_v61, %v1200_v58  ;;  %v1320_v36 = vpop.permute.xlu1 %1319  ;;  %2426 = vlog2.f32 %v1169_v19  ;;  %v1539_v20 = vadd.f32 %v3286_v34, %v3648_v4 }
 0x311   : > { %v1334_v54 = vsub.f32 %v3296_v43, %v1320_v36  ;;  %2428 = vrcp.f32 %v1169_v19 }
 0x312   : > { %v2411_v45 = vpop.eup %2410  ;;  %v1212_v18 = vadd.f32 %v1207_v22, %v1195_v33  ;;  %v1463_v22 = vadd.f32 %v3290_v37, %v3483_v44 }
 0x313   : > { %v1346_v59 = vmul.f32 %v1334_v54, %v1334_v54  ;;  %1065 = vadd.xlane.f32.xlu0 %v2411_v45  ;;  %v2413_v47 = vpop.eup %2412 }
 0x314   : > { %v3673_v29 = vadd.f32 %v1214_v6, %v1212_v18  ;;  %v2415_v15 = vpop.eup %2414  ;;  %2430 = vlog2.f32 %v1463_v22 }
 0x315   : > { %v1351_v53 = vmul.f32 %v2413_v47, %v1346_v59  ;;  %v1254_v2 = vpop.permute.xlu1 %1253  ;;  %v2417_v55 = vpop.eup %2416  ;;  %v1269_v60 = vmul.f32 0.6931472, %v2415_v15  ;;  %2432 = vlog2.f32 %v1462_v41 }
 0x316   : > { %v1262_v16 = vsub.f32 %v3303_v50, %v1254_v2  ;;  %v2419_v35 = vpop.eup %2418  ;;  %2434 = vrcp.f32 %v1462_v41 }
 0x317   : > { %v1358_v17 = vadd.f32 %v1351_v53, %v1339_v3  ;;  %v2421_v28 = vpop.eup %2420  ;;  %v1413_v61 = vmul.f32 0.6931472, %v2419_v35  ;;  %2436 = vlog2.f32 %v1536_v23 }
 0x318   : > { %v1274_v49 = vmul.f32 %v1262_v16, %v1262_v16  ;;  %v2423_v45 = vpop.eup %2422  ;;  %2438 = vrcp.f32 %v1463_v22 }
 0x319   : > { %v1362_v24 = vadd.f32 %v3592_v48, %v1358_v17  ;;  %v2425_v47 = vpop.eup %2424  ;;  %v1123_v44 = vmul.f32 0.6931472, %v2423_v45  ;;  %2440 = vrcp.f32 %v1536_v23 }
 0x31a   : > { %v1281_v6 = vmul.f32 %v2417_v55, %v1274_v49  ;;  %v1394_v10 = vpop.permute.xlu1 %1393  ;;  %v2427_v16 = vpop.eup %2426  ;;  %v1537_v49 = vadd.f32 %v3290_v37, %v3617_v21 }
 0x31b   : > { %v1408_v32 = vsub.f32 %v3296_v43, %v1394_v10  ;;  %v3681_v11 = vadd.f32 %v1362_v24, %v3612_v0  ;;  %v2429_v19 = vpop.eup %2428  ;;  %v1197_v24 = vmul.f32 0.6931472, %v2427_v16 }
 0x31c   : > { %v1286_v58 = vadd.f32 %v1281_v6, %v1269_v60 }
 0x31d   : > { %v1420_v33 = vmul.f32 %v1408_v32, %v1408_v32  ;;  %v1538_v32 = vadd.f32 %v3281_v30, %v3635_v9 }
 0x31e   : > { %v1289_v26 = vadd.f32 %v1288_v8, %v1286_v58 }
 0x31f   : > { %v1425_v48 = vmul.f32 %v2421_v28, %v1420_v33  ;;  %v1110_v36 = vpop.permute.xlu1 %1109 }
 0x320   : > { %v1290_v54 = vadd.f32 %v1289_v26, %v3623_v57  ;;  %v1115_v0 = vsub.f32 %v3307_v52, %v1110_v36  ;;  %v3696_v57 = vadd.f32 %v3281_v30, %v3486_v5 }
 0x321   : > { %v1432_v18 = vadd.f32 %v1425_v48, %v1413_v61  ;;  %v2431_v61 = vpop.eup %2430 }
 0x322   : > { %v1127_v59 = vmul.f32 %v1115_v0, %v1115_v0  ;;  %v1291_v3 = vrot.slane %v1290_v54, 4  ;;  %2442 = vlog2.f32 %v3696_v57  ;;  %v2433_v48 = vpop.eup %2432 }
 0x323   : > { %v3692_v8 = vadd.f32 %v3603_v46, %v1432_v18  ;;  %v1546_v46 = vpop.permute.xlu0 %1545  ;;  %2444 = vlog2.f32 %v1390_v38  ;;  %v2435_v9 = vpop.eup %2434 }
 0x324   : > { %v1135_v53 = vmul.f32 %v2425_v47, %v1127_v59  ;;  %v1184_v13 = vpop.permute.xlu1 %1183  ;;  %v1292_v55 = vadd.f32 %v1291_v3, %v1290_v54  ;;  %2446 = vrcp.f32 %v1390_v38  ;;  %v2437_v0 = vpop.eup %2436  ;;  %v1557_v4 = vsub.f32 %v3305_v51, %v1546_v46 }
 0x325   : > { %v1189_v2 = vsub.f32 %v3307_v52, %v1184_v13  ;;  %2448 = vlog2.f32 %v1537_v49  ;;  %v2439_v47 = vpop.eup %2438 }
 0x326   : > { %v1139_v15 = vadd.f32 %v1135_v53, %v1123_v44  ;;  %v1293_v28 = vrot.slane %v1292_v55, 2  ;;  %2450 = vrcp.f32 %v1537_v49  ;;  %v1489_v44 = vmul.f32 0.6931472, %v2431_v61  ;;  %v2441_v3 = vpop.eup %2440 }
 0x327   : > { %v1201_v17 = vmul.f32 %v1189_v2, %v1189_v2  ;;  %v1550_v33 = vpop.permute.xlu0 %1549  ;;  %2452 = vlog2.f32 %v1317_v40  ;;  %v1487_v53 = vmul.f32 0.6931472, %v2433_v48 }
 0x328   : > { %v1142_v5 = vadd.f32 %v3651_v63, %v1139_v15  ;;  %2454 = vlog2.f32 %v1538_v32  ;;  %v1294_v45 = vadd.f32 %v1293_v28, %v1292_v55  ;;  %v1558_v55 = vsub.f32 %v3303_v50, %v1550_v33 }
 0x329   : > { %v1209_v35 = vmul.f32 %v2429_v19, %v1201_v17  ;;  %v1468_v60 = vpop.permute.xlu1 %1467  ;;  %2456 = vrcp.f32 %v1538_v32  ;;  %v1610_v32 = vadd.f32 %v3283_v31, %v3626_v25  ;;  %v1561_v31 = vmul.f32 0.6931472, %v2437_v0 }
 0x32a   : > { %v1143_v6 = vrot.slane %v1142_v5, 4  ;;  %v1482_v10 = vsub.f32 %v3296_v43, %v1468_v60  ;;  %2458 = vlog2.f32 %v1539_v20  ;;  %v1611_v25 = vadd.f32 %v3290_v37, %v3629_v39 }
 0x32b   : > { %v1213_v21 = vadd.f32 %v1209_v35, %v1197_v24  ;;  %2460 = vrcp.f32 %v1539_v20  ;;  %v1554_v38 = vpop.permute.xlu0 %1553 }
 0x32c   : > { %v1144_v63 = vadd.f32 %v1143_v6, %v1142_v5  ;;  %v1494_v58 = vmul.f32 %v1482_v10, %v1482_v10  ;;  %v3715_v16 = vpop.eup %2442  ;;  %v1295_v5 = vrot.slane %v1294_v45, 1  ;;  %2462 = vrcp.f32 %v1317_v40 }
 0x32d   : > { %v1216_v26 = vadd.f32 %v3673_v29, %v1213_v21  ;;  %v1472_v22 = vpop.permute.xlu1 %1471  ;;  %v2445_v49 = vpop.eup %2444  ;;  %v1569_v21 = vmul.f32 %v1557_v4, %v1557_v4  ;;  %v1559_v28 = vsub.f32 %v3307_v52, %v1554_v38  ;;  %2464 = vrcp.f32 %v3696_v57 }
 0x32e   : > { %v1145_v36 = vrot.slane %v1144_v63, 2  ;;  %v1483_v41 = vsub.f32 %v3305_v51, %v1472_v22  ;;  %v1499_v23 = vmul.f32 %v2435_v9, %v1494_v58  ;;  %v2447_v60 = vpop.eup %2446  ;;  %v1417_v61 = vmul.f32 0.6931472, %v2445_v49 }
 0x32f   : > { %v1217_v54 = vrot.slane %v1216_v26, 4  ;;  %v2449_v10 = vpop.eup %2448  ;;  %v1570_v40 = vmul.f32 %v1558_v55, %v1558_v55  ;;  %2466 = vlog2.f32 %v1610_v32 }
 0x330   : > { %v1146_v18 = vadd.f32 %v1145_v36, %v1144_v63  ;;  %v1495_v59 = vmul.f32 %v1483_v41, %v1483_v41  ;;  %v1506_v24 = vadd.f32 %v1499_v23, %v1487_v53  ;;  %v2451_v58 = vpop.eup %2450  ;;  %v1296_v36 = vadd.f32 %v1295_v5, %v1294_v45 }
 0x331   : > { %v1218_v29 = vadd.f32 %v1217_v54, %v1216_v26  ;;  %v2453_v20 = vpop.eup %2452  ;;  %2468 = vrcp.f32 %v1610_v32 }
 0x332   : > { %v1501_v13 = vmul.f32 %v2439_v47, %v1495_v59  ;;  %v1402_v2 = vpop.permute.xlu1 %1401  ;;  %v1147_v15 = vrot.slane %v1146_v18, 1  ;;  %v2455_v9 = vpop.eup %2454  ;;  %v1575_v59 = vmul.f32 %v2451_v58, %v1569_v21  ;;  %v1297_v0 = vmul.f32 -0.5, %v1296_v36 }
 0x333   : > { %v1219_v17 = vrot.slane %v1218_v29, 2  ;;  %v1410_v19 = vsub.f32 %v3303_v50, %v1402_v2  ;;  %2470 = vlog2.f32 %v1611_v25  ;;  %v1565_v39 = vmul.f32 0.6931472, %v2455_v9 }
 0x334   : > { %v1507_v35 = vadd.f32 %v1501_v13, %v1489_v44  ;;  %v1148_v26 = vadd.f32 %v1147_v15, %v1146_v18  ;;  %v1571_v18 = vmul.f32 %v1559_v28, %v1559_v28  ;;  %v2457_v44 = vpop.eup %2456  ;;  %2472 = vrcp.f32 %v1611_v25 }
 0x335   : > { %v1220_v6 = vadd.f32 %v1219_v17, %v1218_v29  ;;  %v1422_v46 = vmul.f32 %v1410_v19, %v1410_v19  ;;  %v1563_v29 = vmul.f32 0.6931472, %v2449_v10  ;;  %v2459_v45 = vpop.eup %2458  ;;  %v1577_v13 = vmul.f32 %v2457_v44, %v1570_v40 }
 0x336   : > { %v3722_v63 = vadd.f32 %v1507_v35, %v1506_v24  ;;  %v1149_v53 = vmul.f32 -0.5, %v1148_v26  ;;  %v2461_v37 = vpop.eup %2460  ;;  %v1391_v24 = vadd.f32 %v3286_v34, %v3508_v12  ;;  %v1630_v10 = vsub.f32 %v3296_v43, %v3655_v1 }
 0x337   : > { %v1221_v33 = vrot.slane %v1220_v6, 1  ;;  %v1429_v22 = vmul.f32 %v2447_v60, %v1422_v46  ;;  %v1542_v48 = vpop.permute.xlu1 %1541  ;;  %v1581_v19 = vadd.f32 %v1575_v59, %v1563_v29  ;;  %v1579_v49 = vmul.f32 %v2461_v37, %v1571_v18 }
 0x338   : > { %v1556_v41 = vsub.f32 %v3296_v43, %v1542_v48  ;;  %v1582_v60 = vadd.f32 %v1577_v13, %v1565_v39  ;;  %v1345_v46 = vmul.f32 0.6931472, %v2453_v20  ;;  %2474 = vlog2.f32 %v1391_v24 }
 0x339   : > { %v1222_v54 = vadd.f32 %v1221_v33, %v1220_v6  ;;  %v1434_v23 = vadd.f32 %v1429_v22, %v1417_v61  ;;  %v1465_v12 = vadd.f32 %v3286_v34, %v3637_v42  ;;  %2476 = vrcp.f32 %v1391_v24 }
 0x33a   : > { %v1568_v47 = vmul.f32 %v1556_v41, %v1556_v41  ;;  %v1642_v20 = vmul.f32 %v1630_v10, %v1630_v10  ;;  %v1491_v1 = vmul.f32 0.6931472, %v3715_v16 }
 0x33b   : > { %v1223_v4 = vmul.f32 -0.5, %v1222_v54  ;;  %v3729_v57 = vadd.f32 %v3692_v8, %v1434_v23  ;;  %v2463_v8 = vpop.eup %2462  ;;  %v1612_v23 = vadd.f32 %v3281_v30, %v3646_v27  ;;  %2478 = vlog2.f32 %v1465_v12 }
 0x33c   : > { %v1573_v2 = vmul.f32 %v2441_v3, %v1568_v47  ;;  %v1332_v38 = vpop.permute.xlu1 %1331  ;;  %v1567_v3 = vmul.f32 0.6931472, %v2459_v45  ;;  %v2465_v28 = vpop.eup %2464  ;;  %2480 = vrcp.f32 %v1465_v12  ;;  %v1613_v30 = vadd.f32 %v3286_v34, %v3662_v7 }
 0x33d   : > { %v1337_v15 = vsub.f32 %v3307_v52, %v1332_v38  ;;  %v1668_v17 = vsel %vm1038_vm1, %v1149_v53, %v1223_v4  ;;  %v2467_v22 = vpop.eup %2466  ;;  %2482 = vlog2.f32 %v1612_v23 }
 0x33e   : > { %v1580_v55 = vadd.f32 %v1573_v2, %v1561_v31  ;;  %v3734_v5 = vsel %vm1040_vm2, %v1668_v17, %v1297_v0  ;;  %v1583_v58 = vadd.f32 %v1579_v49, %v1567_v3  ;;  %v2469_v43 = vpop.eup %2468  ;;  %v1635_v59 = vmul.f32 0.6931472, %v2467_v22 }
 0x33f   : > { %v1349_v35 = vmul.f32 %v1337_v15, %v1337_v15  ;;  %v2471_v31 = vpop.eup %2470  ;;  %v1647_v18 = vmul.f32 %v2469_v43, %v1642_v20  ;;  %2484 = vrcp.f32 %v1612_v23 }
 0x340   : > { %v1584_v6 = vadd.f32 %v1581_v19, %v1580_v55  ;;  %v2473_v29 = vpop.eup %2472  ;;  %v1637_v16 = vmul.f32 0.6931472, %v2471_v31  ;;  %2486 = vlog2.f32 %v1613_v30 }
 0x341   : > { %v1357_v32 = vmul.f32 %v2463_v8, %v1349_v35  ;;  %v1476_v21 = vpop.permute.xlu1 %1475  ;;  %v1654_v0 = vadd.f32 %v1647_v18, %v1635_v59  ;;  %2488 = vrcp.f32 %v1613_v30 }
 0x342   : > { %v1585_v61 = vadd.f32 %v1584_v6, %v1582_v60  ;;  %v1484_v26 = vsub.f32 %v3303_v50, %v1476_v21  ;;  %v2475_v13 = vpop.eup %2474 }
 0x343   : > { %v1361_v33 = vadd.f32 %v1357_v32, %v1345_v46  ;;  %v2477_v37 = vpop.eup %2476 }
 0x344   : > { %v1586_v48 = vadd.f32 %v1585_v61, %v1583_v58  ;;  %v1496_v40 = vmul.f32 %v1484_v26, %v1484_v26 }
 0x345   : > { %v1364_v36 = vadd.f32 %v3681_v11, %v1361_v33  ;;  %v2479_v24 = vpop.eup %2478 }
 0x346   : > { %v1503_v41 = vmul.f32 %v2465_v28, %v1496_v40  ;;  %v1620_v9 = vpop.permute.xlu1 %1619  ;;  %v1587_v17 = vrot.slane %v1586_v48, 4  ;;  %v2481_v7 = vpop.eup %2480  ;;  %v1493_v46 = vmul.f32 0.6931472, %v2479_v24 }
 0x347   : > { %v1365_v25 = vrot.slane %v1364_v36, 4  ;;  %v1631_v54 = vsub.f32 %v3305_v51, %v1620_v9  ;;  %v2483_v28 = vpop.eup %2482 }
 0x348   : > { %v1508_v42 = vadd.f32 %v1503_v41, %v1491_v1  ;;  %v1588_v6 = vadd.f32 %v1587_v17, %v1586_v48  ;;  %v1639_v43 = vmul.f32 0.6931472, %v2483_v28 }
 0x349   : > { %v1366_v47 = vadd.f32 %v1365_v25, %v1364_v36  ;;  %v1643_v44 = vmul.f32 %v1631_v54, %v1631_v54  ;;  %v2485_v40 = vpop.eup %2484 }
 0x34a   : > { %v1511_v11 = vadd.f32 %v3722_v63, %v1508_v42  ;;  %v1419_v63 = vmul.f32 0.6931472, %v2475_v13  ;;  %v1589_v12 = vrot.slane %v1588_v6, 2  ;;  %v2487_v41 = vpop.eup %2486 }
 0x34b   : > { %v1367_v53 = vrot.slane %v1366_v47, 2  ;;  %v1649_v4 = vmul.f32 %v2473_v29, %v1643_v44  ;;  %v1406_v45 = vpop.permute.xlu1 %1405  ;;  %v2489_v23 = vpop.eup %2488  ;;  %v1641_v42 = vmul.f32 0.6931472, %v2487_v41 }
 0x34c   : > { %v1411_v51 = vsub.f32 %v3307_v52, %v1406_v45  ;;  %v1590_v54 = vadd.f32 %v1589_v12, %v1588_v6 }
 0x34d   : > { %v1368_v27 = vadd.f32 %v1367_v53, %v1366_v47  ;;  %v1655_v2 = vadd.f32 %v1649_v4, %v1637_v16 }
 0x34e   : > { %v1423_v38 = vmul.f32 %v1411_v51, %v1411_v51  ;;  %v1591_v16 = vrot.slane %v1590_v54, 1 }
 0x34f   : > { %v1369_v39 = vrot.slane %v1368_v27, 1  ;;  %v1658_v15 = vadd.f32 %v1655_v2, %v1654_v0 }
 0x350   : > { %v1431_v19 = vmul.f32 %v2477_v37, %v1423_v38  ;;  %v1480_v49 = vpop.permute.xlu1 %1479  ;;  %v1592_v13 = vadd.f32 %v1591_v16, %v1590_v54 }
 0x351   : > { %v1370_v55 = vadd.f32 %v1369_v39, %v1368_v27  ;;  %v1485_v8 = vsub.f32 %v3307_v52, %v1480_v49 }
 0x352   : > { %v1435_v35 = vadd.f32 %v1431_v19, %v1419_v63  ;;  %v1593_v38 = vmul.f32 -0.5, %v1592_v13 }
 0x353   : > { %v1371_v3 = vmul.f32 -0.5, %v1370_v55  ;;  %v1497_v34 = vmul.f32 %v1485_v8, %v1485_v8  ;;  %v1069_v8 = vmul.f32 1.442695, %v1068_v14 }
 0x354   : > { %v1438_v60 = vadd.f32 %v3729_v57, %v1435_v35  ;;  %v1067_v35 = vld [vmem:[%s3193_s4] sm:$0xff] }
 0x355   : > { %v1505_v10 = vmul.f32 %v2481_v7, %v1497_v34  ;;  %v1624_v32 = vpop.permute.xlu1 %1623  ;;  %v1670_v21 = vsel %vm1042_vm3, %v3734_v5, %v1371_v3  ;;  %2490 = vpow2.f32 %v1069_v8 }
 0x356   : > { %v1439_v58 = vrot.slane %v1438_v60, 4  ;;  %v1632_v61 = vsub.f32 %v3303_v50, %v1624_v32 }
 0x357   : > { %v1509_v26 = vadd.f32 %v1505_v10, %v1493_v46 }
 0x358   : > { %v1440_v33 = vadd.f32 %v1439_v58, %v1438_v60  ;;  %v1644_v22 = vmul.f32 %v1632_v61, %v1632_v61  ;;  %v3770_v60 = vld [vmem:[%s3191_s11 + $0x8] sm:$0xff] }
 0x359   : > { %v1512_v20 = vadd.f32 %v1511_v11, %v1509_v26  ;;  %v1628_v36 = vpop.permute.xlu1 %1627 }
 0x35a   : > { %v1441_v57 = vrot.slane %v1440_v33, 2  ;;  %v1651_v48 = vmul.f32 %v2485_v40, %v1644_v22  ;;  %v1633_v1 = vsub.f32 %v3307_v52, %v1628_v36 }
 0x35b   : > { %v1513_v9 = vrot.slane %v1512_v20, 4 }
 0x35c   : > { %v1442_v31 = vadd.f32 %v1441_v57, %v1440_v33  ;;  %v1656_v5 = vadd.f32 %v1651_v48, %v1639_v43  ;;  %v1645_v25 = vmul.f32 %v1633_v1, %v1633_v1 }
 0x35d   : > { %v1514_v50 = vadd.f32 %v1513_v9, %v1512_v20 }
 0x35e   : > { %v1443_v59 = vrot.slane %v1442_v31, 1  ;;  %v1659_v18 = vadd.f32 %v1658_v15, %v1656_v5  ;;  %v1653_v47 = vmul.f32 %v2489_v23, %v1645_v25 }
 0x35f   : > { %v1515_v44 = vrot.slane %v1514_v50, 2  ;;  %v2491_v24 = vpop.eup %2490 }
 0x360   : > { %v1444_v29 = vadd.f32 %v1443_v59, %v1442_v31  ;;  %v1657_v11 = vadd.f32 %v1653_v47, %v1641_v42  ;;  %v1071_v3 = vmul.f32 %v2491_v24, %v1067_v35 }
 0x361   : > { %v1516_v53 = vadd.f32 %v1515_v44, %v1514_v50 }
 0x362   : > { %v1660_v4 = vadd.f32 %v1659_v18, %v1657_v11  ;;  %v1445_v45 = vmul.f32 -0.5, %v1444_v29 }
 0x363   : > { %v1517_v52 = vrot.slane %v1516_v53, 1 }
 0x364   : > { %v1661_v51 = vrot.slane %v1660_v4, 4  ;;  %v1671_v0 = vsel %vm1044_vm4, %v1670_v21, %v1445_v45 }
 0x365   : > { %v1518_v30 = vadd.f32 %v1517_v52, %v1516_v53 }
 0x366   : > { %v1662_v27 = vadd.f32 %v1661_v51, %v1660_v4 }
 0x367   : > { %v1519_v2 = vmul.f32 -0.5, %v1518_v30 }
 0x368   : > { %v1663_v37 = vrot.slane %v1662_v27, 2 }
 0x369   : > { %v1672_v39 = vsel %vm1046_vm5, %v1671_v0, %v1519_v2 }
 0x36a   : > { %v1664_v15 = vadd.f32 %v1663_v37, %v1662_v27  ;;  %v1673_v63 = vsel %vm1048_vm6, %v1672_v39, %v1593_v38 }
 0x36c   : > { %v1665_v17 = vrot.slane %v1664_v15, 1 }
 0x36e   : > { %v1666_v19 = vadd.f32 %v1665_v17, %v1664_v15 }
 0x370   : > { %v1667_v49 = vmul.f32 -0.5, %v1666_v19 }
 0x372   : > { %v1674_v55 = vsel %vm1050_vm7, %v1673_v63, %v1667_v49 }
 0x373   : > { %1676 = vmax.xlane.f32.xlu0 %v1674_v55  ;;  %1675 = vst [vmem:[%s3189_s14 + $0x8] sm:$0xff] %v1674_v55 }
 0x3a0   : > { %v1066_v34 = vpop.xlane.xlu0 %1065 }
 0x3a1   : > { %v1072_v7 = vadd.f32 %v1071_v3, %v1066_v34 }
 0x3a3   : > { %1074 = vst.msk [vmem:[%s3193_s4] sm:$0xff] %vm1073_vm8, %v1072_v7 }
 0x400   : > { %v1677_v6 = vpop.xlane.xlu0 %1676 }
 0x401   : > { %v3773_v46 = vmax.f32 %v3770_v60, %v1677_v6 }
 0x403   : > { %v1691_v62 = vsub.f32 %v3770_v60, %v3773_v46  ;;  %1697 = vst.msk [vmem:[%s3191_s11 + $0x8] sm:$0xff] %vm1073_vm8, %v3773_v46  ;;  %1682 = vperm.xlu1 %2222, %v3773_v46  }
 0x482   : > { %v1683_v56 = vpop.permute.xlu1 %1682 }
 0x483   : > { %v1685_v14 = vsub.f32 %v1674_v55, %v1683_v56 }
 0x485   : > { %v1686_v10 = vmul.f32 1.442695, %v1685_v14 }
 0x487   : > { %2492 = vpow2.f32 %v1686_v10 }
 0x491   : > { %v2493_v32 = vpop.eup %2492 }
 0x492   : > { %1688 = vadd.xlane.f32.xlu1 %v2493_v32 }
 0x493   : > { %2633 = shalt.err (!%p2630_p0)
}
 0x494   : > { %s2634_s8 = scalar_lea.hbm %s3788_s3, 256  ;;  %s2638_s18 = scalar_lea.hbm %s4019_s6, 512 }
 0x495   : > { %p2635_p2 = scmp.ne.s32.totalorder %s3788_s3, %s2634_s8  ;;  %p2639_p3 = scmp.lt.u32.totalorder %s3788_s3, %s4019_s6 }
 0x496   : > { %p2640_p6 = scmp.lt.u32.totalorder %s2638_s18, %s2634_s8  ;;  %p2642_p10 = scmp.lt.u32.totalorder %s2634_s8, %s3788_s3 }
 0x497   : > { %p2636_p13 = pnand %p2635_p2, %p4020_p12 }
 0x498   : > { %p2641_p8 = por %p2640_p6, %p2639_p3 }
 0x499   : > { %p2637_p5 = pneg %p2636_p13 }
 0x49a   : > { %p2643_p1 = por %p2642_p10, %p2641_p8 }
 0x49c   : > { %p2644_p11 = pnand %p2643_p1, %p2637_p5 }
 0x49e   : > { %2647 = shalt.err (!%p2644_p11)
}
 0x49f   : > { %s2842_s12 = smov 128   ;;  %s4021_s29 = sld [smem:[#allocation23_spill]] }
 0x4a0   : > { %s2843_s13 = smov 8   ;;  %s1717_s9 = sadd.s32 %s2798_s27, %s1986_s5 }
 0x4a1   : > { %2009 = dma.vmem_to_hbm [thread:$0]  (%p4020_p12), %s3791_s20, 256, %s3788_s3, %s3795_s21, %s2842_s12, %s2842_s12, %s2843_s13  }
 0x4a2   : > { %s1987_s8 = sshll.u32 %s1717_s9, 7  ;;  %s1723_s17 = sshll.u32 %s3189_s14, 4  ;;  %s3831_s17 = int_to_ptr.vmem [resolvable:$true] %s1723_s17 }
 0x4a3   : > { %s4022_s15 = sld [smem:[#allocation33_spill]]  ;;  %s1699_s0 = scalar_lea.sflag [#allocation4], %s3160_s28 }
 0x4a4   : > { %s2648_s1 = scalar_lea.vmem %s3831_s17, 256  ;;  %s2844_s3 = smov [#allocation10]  }
 0x4a5   : > { %p2649_p4 = scmp.ne.s32.totalorder %s3831_s17, %s2648_s1  ;;  %p4023_p7 = scmp.ne.s32.totalorder %s4021_s29, 0 }
 0x4a6   : > { %s2652_s27 = sshll.u32 %s2844_s3, 4  ;;  %s2653_s27 = int_to_ptr.vmem [resolvable:$false] %s2652_s27 }
 0x4a7   : > { %p2650_p9 = pnand %p2649_p4, %p4023_p7  ;;  %s2654_s14 = scalar_lea.vmem %s2653_s27, 512 }
 0x4a8   : > { %p2655_p2 = scmp.lt.s32.totalorder %s3831_s17, %s2653_s27  ;;  %p2656_p13 = scmp.lt.s32.totalorder %s2654_s14, %s2648_s1 }
 0x4a9   : > { %s3829_s24 = scalar_lea.hbm %s4022_s15, %s1987_s8  ;;  %p2651_p0 = pneg %p2650_p9 }
 0x4aa   : > { %p2657_p5 = por %p2656_p13, %p2655_p2 }
 0x4ac   : > { %p2658_p3 = pnand %p2657_p5, %p2651_p0 }
 0x4ae   : > { %2661 = shalt.err (!%p2658_p3)
}
 0x4af   : > { %s2662_s5 = scalar_lea.hbm %s3829_s24, 256  ;;  %s2666_s8 = scalar_lea.hbm %s4022_s15, 1024 }
 0x4b0   : > { %p2663_p6 = scmp.ne.s32.totalorder %s3829_s24, %s2662_s5  ;;  %p2667_p1 = scmp.lt.u32.totalorder %s3829_s24, %s4022_s15 }
 0x4b1   : > { %p2668_p11 = scmp.lt.u32.totalorder %s2666_s8, %s2662_s5  ;;  %p2670_p9 = scmp.lt.u32.totalorder %s2662_s5, %s3829_s24 }
 0x4b2   : > { %p2664_p8 = pnand %p2663_p6, %p4023_p7 }
 0x4b3   : > { %p2669_p4 = por %p2668_p11, %p2667_p1 }
 0x4b4   : > { %p2665_p10 = pneg %p2664_p8 }
 0x4b5   : > { %p2671_p0 = por %p2670_p9, %p2669_p4 }
 0x4b7   : > { %p2672_p2 = pnand %p2671_p0, %p2665_p10 }
 0x4b9   : > { %2675 = shalt.err (!%p2672_p2)
}
 0x4ba   : > { %s2845_s1 = smov 512   ;;  %v1692_v21 = vmul.f32 1.442695, %v1691_v62  ;;  %v1690_v58 = vld [vmem:[%s3193_s4 + $0x8] sm:$0xff]  ;;  %s1755_s29 = sshll.u32 %s3193_s4, 4  ;;  %s3871_s29 = int_to_ptr.vmem [resolvable:$true] %s1755_s29 }
 0x4bb   : > { %2008 = dma.vmem_to_hbm [thread:$0]  (%p4023_p7), %s3831_s17, 256, %s3829_s24, %s1699_s0, %s2842_s12, %s2845_s1, %s2843_s13  }
 0x4bc   : > { %2494 = vpow2.f32 %v1692_v21  ;;  %s4024_s28 = sshll.u32 %s4016_s19, 8  ;;  %s4025_s14 = sld [smem:[#allocation35_spill]] }
 0x4bd   : > { %s2676_s0 = scalar_lea.vmem %s3871_s29, 256  ;;  %s2846_s17 = smov [#allocation13]  }
 0x4be   : > { %p2677_p7 = scmp.ne.s32.totalorder %s3871_s29, %s2676_s0  ;;  %s2680_s24 = sshll.u32 %s2846_s17, 4  ;;  %s2681_s24 = int_to_ptr.vmem [resolvable:$false] %s2680_s24 }
 0x4bf   : > { %s2682_s19 = scalar_lea.vmem %s2681_s24, 512  ;;  %p2683_p3 = scmp.lt.s32.totalorder %s3871_s29, %s2681_s24 }
 0x4c0   : > { %p2678_p13 = pnand %p2677_p7, %p4020_p12  ;;  %p2684_p6 = scmp.lt.s32.totalorder %s2682_s19, %s2676_s0 }
 0x4c2   : > { %s3869_s5 = scalar_lea.hbm %s4025_s14, %s4024_s28  ;;  %p2679_p5 = pneg %p2678_p13 }
 0x4c3   : > { %p2685_p8 = por %p2684_p6, %p2683_p3 }
 0x4c5   : > { %p2686_p10 = pnand %p2685_p8, %p2679_p5 }
 0x4c6   : > { %v2495_v28 = vpop.eup %2494 }
 0x4c7   : > { %v1694_v61 = vmul.f32 %v2495_v28, %v1690_v58 }
 0x51f   : > { %v1689_v26 = vpop.xlane.xlu1 %1688 }
 0x520   : > { %v1695_v33 = vadd.f32 %v1694_v61, %v1689_v26 }
 0x522   : > { %1696 = vst.msk [vmem:[%s3193_s4 + $0x8] sm:$0xff] %vm1073_vm8, %v1695_v33 }
 0x523   : > { %2689 = shalt.err (!%p2686_p10)
}
 0x524   : > { %s2690_s4 = scalar_lea.hbm %s3869_s5, 256  ;;  %s2694_s8 = scalar_lea.hbm %s4025_s14, 512 }
 0x525   : > { %p2691_p1 = scmp.ne.s32.totalorder %s3869_s5, %s2690_s4  ;;  %p2695_p9 = scmp.lt.u32.totalorder %s3869_s5, %s4025_s14 }
 0x526   : > { %p2696_p0 = scmp.lt.u32.totalorder %s2694_s8, %s2690_s4  ;;  %p2698_p7 = scmp.lt.u32.totalorder %s2690_s4, %s3869_s5 }
 0x527   : > { %p2692_p11 = pnand %p2691_p1, %p4020_p12 }
 0x528   : > { %p2697_p2 = por %p2696_p0, %p2695_p9 }
 0x529   : > { %p2693_p4 = pneg %p2692_p11 }
 0x52a   : > { %p2699_p13 = por %p2698_p7, %p2697_p2 }
 0x52c   : > { %p2700_p5 = pnand %p2699_p13, %p2693_p4 }
 0x52e   : > { %2703 = shalt.err (!%p2700_p5)
}
 0x52f   : > { %2010 = dma.vmem_to_hbm [thread:$0]  (%p4020_p12), %s3871_s29, 256, %s3869_s5, %s3795_s21, %s2842_s12, %s2842_s12, %s2843_s13  }
 0x530 PF: > { %s4026_s1 = sld [smem:[#allocation20_spill]]  ;;  %s4027_s28 = sld [smem:[#allocation24_spill]] }
 0x531   : > { %p2043_p3 = scmp.ge.s32.totalorder %s2814_s7, 2 }
 0x536   : > { %s1770_s3 = sand.u32 1, %s4026_s1   ;;  %p4028_p6 = scmp.ne.s32.totalorder %s4027_s28, 0 }
 0x537   : > { %s1771_s27 = scalar_lea.sflag [#allocation4], %s1770_s3 }
 0x538   : > { %p2029_p8 = pnand %p2043_p3, %p4028_p6 }
 0x53a   : > { %2765 = dma.done.wait (!%p2029_p8), %s1771_s27, 256  }
 0x53b   : > { %2767 = vsyncadd (!%p2029_p8), %s1771_s27, 4294967040  ;;  %s4029_s10 = sadd.s32 4294967294, %s2814_s7   ;;  %s4030_s0 = sld [smem:[#allocation26_spill]] }
 0x53c   : > { %s1779_s17 = sand.u32 1, %s4029_s10  }
 0x53d   : > { %s1780_s24 = scalar_lea.sflag [#allocation12], %s1779_s17 }
 0x541   : > { %p4031_p10 = scmp.ne.s32.totalorder %s4030_s0, 0 }
 0x543   : > { %p2032_p1 = pnand %p2043_p3, %p4031_p10 }
 0x545   : > { %2769 = dma.done.wait (!%p2032_p1), %s1780_s24, 512  }
 0x546   : > { %2771 = vsyncadd (!%p2032_p1), %s1780_s24, 4294966784  ;;  %s30_s7 = sadd.s32 1, %s2814_s7   ;;  %s4032_s27 = sld [smem:[#allocation22_spill]] }
 0x547   : > { %p27_p12 = scmp.ge.s32.totalorder %s30_s7, 6   ;;  %s4033_s29 = sld [smem:[#allocation27_spill]] }
 0x548   : > { %s4034_s12 = sld [smem:[#allocation28_spill]]  ;;  %s4035_s21 = smov %s2778_s22 }
 0x549   : > { %s4036_s22 = smov %s2782_s23  ;;  %s4037_s23 = smov %s3081_s16 }
 0x54a   : > { %s4038_s24 = smov %s2790_s25  ;;  %s4039_s25 = smov %s2794_s26 }
 0x54b   : > { %s4040_s26 = smov %s3084_s2  ;;  %s4041_s28 = smov %s2810_s30 }
 0x54c   :  { %29 = sbr.rel (!%p27_p12) target bundleno = 22 (0x16), region = 138 }
 0x54e   : > { %s4042_s30 = smov %s4034_s12 }
 0x553   :  { %1794 = vsyncpa [#allocation3], 1 }
 0x554   :  { %1796 = vsyncpa [#allocation3 + $0x1], 1 }
 0x555   :  { %1797 = vsyncpa [#allocation6], 1 }
 0x556   :  { %1799 = vsyncpa [#allocation6 + $0x1], 1 }
 0x557   :  { %1800 = vsyncpa [#allocation9], 1 }
 0x558   :  { %1801 = vsyncpa [#allocation4], 1 }
 0x559   :  { %1803 = vsyncpa [#allocation4 + $0x1], 1 }
 0x55a   :  { %1804 = vsyncpa [#allocation12], 1 }
 0x55b   :  { %1806 = vsyncpa [#allocation12 + $0x1], 1 }

</bundles_post_ra>
